<compile_context>
chip_gen: v7x
topology: tpu7x:2x2x1
jax: 0.10.0
libtpu: 0.0.40
codegen_flags: <defaults>
</compile_context>

<pallas_src>
import functools

import jax
import jax.numpy as jnp
import numpy as np
from jax.experimental import pallas as pl
from jax.experimental.pallas import tpu as pltpu


def gru_kernel(x_ref, h0_ref, wmf_ref, bm_ref, wx_ref, bx_ref, wh_ref, g_ref, bt_ref,
               out_ref, *, B, C, L, K, PAD, S, W, STEPS, eps):
    f32 = jnp.float32

    xlay = x_ref[...]                                            # (C, W) padded-segment layout

    # ---------- one-time work (outside the recurrence) ----------
    # Stacked x-side projections [n; z; r] with ALL gate biases folded in (done once).
    px = jnp.dot(wx_ref[...], xlay, preferred_element_type=f32) + bx_ref[...]  # (C+2, W)
    px_n = px[:C]
    px_z = px[C:C + 1]
    px_r = px[C + 1:C + 2]

    wmf = wmf_ref[...]                                           # (C, K*C)
    bm = bm_ref[...]                                             # (C, 1)
    wh = wh_ref[...]                                             # (C+2, C)

    col = jax.lax.broadcasted_iota(jnp.int32, (1, W), 1)

    def seg_mask(lo, hi):
        # Columns [b*S + lo, b*S + hi) for every batch segment (lo/hi are Python ints).
        m = None
        for b in range(B):
            mb = (col >= b * S + lo) & (col < b * S + hi)
            m = mb if m is None else (m | mb)
        return m

    # TrainableHState: same (C,1) vector at every position (masked to the valid window below).
    h = jnp.broadcast_to(h0_ref[...], (C, W))

    # ---------- the recurrence (STEPS is small and static -> Python-unrolled) ----------
    for i in range(STEPS):
        # Zero everything outside the current valid window; the >= PAD zero gap around each
        # segment doubles as the mixer conv's zero padding (no cross-batch leakage: the conv
        # footprint of a valid column never leaves its own segment).
        h = jnp.where(seg_mask(PAD + i, PAD + L), h, 0.0)

        # Mixer: K-tap conv as a single im2col matmul; taps gathered with static lane rolls.
        taps = [h if k == PAD else pltpu.roll(h, shift=(PAD - k) % W, axis=1)
                for k in range(K)]
        slab = jnp.concatenate(taps, axis=0)                     # (K*C, W)
        hm = jnp.maximum(jnp.dot(wmf, slab, preferred_element_type=f32) + bm, 0.0)

        # Gates: ONE stacked matmul for the z/r/n h-side projections.
        ph = jnp.dot(wh, hm, preferred_element_type=f32)         # (C+2, W)
        zt = jax.nn.sigmoid(px_z + ph[C:C + 1])                  # (1, W)
        rt = jax.nn.sigmoid(px_r + ph[C + 1:C + 2])              # (1, W)
        nt = jnp.tanh(px_n + ph[:C] * rt)                        # Wnh@(h*rt) == (Wnh@h)*rt
        hnew = (1.0 - zt) * hm + zt * nt                         # (C, W)

        # Trim last position + BatchNorm1d (training mode) over (batch, length).
        Ln = L - i - 1
        hv = jnp.where(seg_mask(PAD + i, PAD + L - 1), hnew, 0.0)
        inv_n = 1.0 / float(B * Ln)
        mean = jnp.sum(hv, axis=1, keepdims=True) * inv_n        # (C, 1)
        ex2 = jnp.sum(hv * hv, axis=1, keepdims=True) * inv_n
        var = ex2 - mean * mean                                  # biased variance
        scale = jax.lax.rsqrt(var + eps) * g_ref[i]
        h = (hv - mean) * scale + bt_ref[i]

        if i + 1 < STEPS:
            # x is consumed from the left, so h moves one lane to the right to stay aligned
            # with the x projections. The wrapped-in column lands in a pad column and is
            # re-masked at the top of the next step.
            h = pltpu.roll(h, shift=1, axis=1)

    # Single unmasked lane-dense store; per-batch window extraction happens in the wrapper.
    out_ref[...] = h


def parallel_gru_v1(x, params, *, num_recurrent_steps=3, mixer_amount=25):
    B, C, L = x.shape
    K = mixer_amount
    PAD = K // 2
    S = L + 2 * PAD                    # per-batch segment width (>= PAD of zeros each side)
    W = ((B * S + 127) // 128) * 128   # lane-dense total width
    out_L = L - num_recurrent_steps
    f32 = jnp.float32

    # ----- wrapper-side layout plumbing: x -> padded-segment layout (C, W) -----
    xseg = jnp.pad(x.astype(f32), ((0, 0), (0, 0), (PAD, S - PAD - L)))       # (B, C, S)
    xlay = jnp.transpose(xseg, (1, 0, 2)).reshape(C, B * S)
    xlay = jnp.pad(xlay, ((0, 0), (0, W - B * S)))                            # (C, W)

    # ----- wrapper-side weight packing (layout plumbing only) -----
    # Mixer (C, C, K) -> (C, K*C) with wm_flat[o, k*C + c] = W[o, c, k]
    wm_flat = jnp.transpose(params["wm"], (0, 2, 1)).reshape(C, K * C).astype(f32)
    bm = params["bm"].reshape(C, 1).astype(f32)
    # Stacked x-side projection rows: [Wnx (C); wzx (1); wrx (1)], h-side biases folded in.
    wx_all = jnp.concatenate([params["wnx"], params["wzx"], params["wrx"]],
                             axis=0).astype(f32)
    bx_all = jnp.concatenate([params["bnx"] + params["bnh"],
                              params["bzx"] + params["bzh"],
                              params["brx"] + params["brh"]]).reshape(C + 2, 1).astype(f32)
    # Stacked h-side projection rows: [Wnh (C); wzh (1); wrh (1)] (no bias: folded above).
    wh_all = jnp.concatenate([params["wnh"], params["wzh"], params["wrh"]],
                             axis=0).astype(f32)
    gamma = params["gamma"].reshape(num_recurrent_steps, C, 1).astype(f32)
    beta = params["beta"].reshape(num_recurrent_steps, C, 1).astype(f32)
    h0 = params["h0"].reshape(C, 1).astype(f32)

    kernel = functools.partial(gru_kernel, B=B, C=C, L=L, K=K, PAD=PAD, S=S, W=W,
                               STEPS=num_recurrent_steps, eps=1e-5)
    vmem = lambda: pl.BlockSpec(memory_space=pltpu.MemorySpace.VMEM)
    h_wide = pl.pallas_call(
        kernel,
        out_shape=jax.ShapeDtypeStruct((C, W), f32),
        in_specs=[vmem() for _ in range(9)],
        out_specs=vmem(),
    )(xlay, h0, wm_flat, bm, wx_all, bx_all, wh_all, gamma, beta)

    # ----- wrapper-side layout plumbing: extract each batch's valid window -----
    i = num_recurrent_steps - 1
    outs = [h_wide[:, b * S + PAD + i: b * S + PAD + L - 1] for b in range(B)]
    return jnp.stack(outs, axis=0)                               # (B, C, out_L)


def reference(x, p, steps, K):
    """Pure-JAX reference of ParallelGRULayerv1 (validation only)."""
    PAD = K // 2
    B, C, L = x.shape
    hi = jax.lax.Precision.HIGHEST
    h = jnp.broadcast_to(p["h0"][None, :, :], (B, C, L))
    for i in range(steps):
        Lc = h.shape[2]
        hp = jnp.pad(h, ((0, 0), (0, 0), (PAD, PAD)))
        acc = jnp.zeros((B, C, Lc), jnp.float32) + p["bm"][None, :, None]
        for k in range(K):
            acc = acc + jnp.einsum("oc,bcl->bol", p["wm"][:, :, k],
                                   hp[:, :, k:k + Lc], precision=hi)
        h = jnp.maximum(acc, 0.0)

        def c1(w, b, v):
            return jnp.einsum("oc,bcl->bol", w, v, precision=hi) + b[None, :, None]

        zt = jax.nn.sigmoid(c1(p["wzx"], p["bzx"], x) + c1(p["wzh"], p["bzh"], h))
        rt = jax.nn.sigmoid(c1(p["wrx"], p["brx"], x) + c1(p["wrh"], p["brh"], h))
        nt = jnp.tanh(c1(p["wnx"], p["bnx"], x) + c1(p["wnh"], p["bnh"], h * rt))
        h = (1.0 - zt) * h + zt * nt
        x = x[:, :, 1:]
        h = h[:, :, :-1]
        mean = jnp.mean(h, axis=(0, 2), keepdims=True)
        var = jnp.mean((h - mean) ** 2, axis=(0, 2), keepdims=True)
        h = (h - mean) / jnp.sqrt(var + 1e-5) * p["gamma"][i][None, :, None] \
            + p["beta"][i][None, :, None]
    return h


if __name__ == "__main__":
    B, C, L = 2, 8, 32            # batch, num_filters, sequence length
    STEPS, K = 3, 25              # num_recurrent_steps, mixer_amount (module defaults)

    key = jax.random.PRNGKey(0)
    ks = jax.random.split(key, 16)
    f32 = jnp.float32
    x = jax.random.normal(ks[0], (B, C, L), f32)

    # Parameter shapes mirror the nn.Module:
    #   hinit.h (1,C,1) -> (C,1); mixer Conv1d (C,C,K) + (C,)
    #   s2s{z,r}{x,h}: Conv1d(C,1,1) -> (1,C)+(1,); s2sn{x,h}: Conv1d(C,C,1) -> (C,C)+(C,)
    #   BatchNorm affine weight/bias (PyTorch init: ones/zeros)
    params = {
        "h0":  jax.random.normal(ks[1], (C, 1), f32),
        "wm":  jax.random.normal(ks[2], (C, C, K), f32) / np.sqrt(C * K),
        "bm":  jax.random.normal(ks[3], (C,), f32) * 0.1,
        "wzx": jax.random.normal(ks[4], (1, C), f32) / np.sqrt(C),
        "bzx": jax.random.normal(ks[5], (1,), f32) * 0.1,
        "wzh": jax.random.normal(ks[6], (1, C), f32) / np.sqrt(C),
        "bzh": jax.random.normal(ks[7], (1,), f32) * 0.1,
        "wrx": jax.random.normal(ks[8], (1, C), f32) / np.sqrt(C),
        "brx": jax.random.normal(ks[9], (1,), f32) * 0.1,
        "wrh": jax.random.normal(ks[10], (1, C), f32) / np.sqrt(C),
        "brh": jax.random.normal(ks[11], (1,), f32) * 0.1,
        "wnx": jax.random.normal(ks[12], (C, C), f32) / np.sqrt(C),
        "bnx": jax.random.normal(ks[13], (C,), f32) * 0.1,
        "wnh": jax.random.normal(ks[14], (C, C), f32) / np.sqrt(C),
        "bnh": jax.random.normal(ks[15], (C,), f32) * 0.1,
        "gamma": jnp.ones((STEPS, C), f32),
        "beta":  jnp.zeros((STEPS, C), f32),
    }

    out = parallel_gru_v1(x, params, num_recurrent_steps=STEPS, mixer_amount=K)
    out = jax.block_until_ready(out)
    assert out.shape == (B, C, L - STEPS), out.shape

    ref = reference(x, params, STEPS, K)
    np.testing.assert_allclose(np.asarray(out), np.asarray(ref),
                               atol=5e-3, rtol=5e-3)
    print("KERNEL_OK")
</pallas_src>

<mosaic_0001>
module attributes {stable_mosaic.version = 11 : i64} {
  func.func @gru_kernel(%arg0: memref<8x128xf32, #tpu.memory_space<vmem>>, %arg1: memref<8x1xf32, #tpu.memory_space<vmem>>, %arg2: memref<8x200xf32, #tpu.memory_space<vmem>>, %arg3: memref<8x1xf32, #tpu.memory_space<vmem>>, %arg4: memref<10x8xf32, #tpu.memory_space<vmem>>, %arg5: memref<10x1xf32, #tpu.memory_space<vmem>>, %arg6: memref<10x8xf32, #tpu.memory_space<vmem>>, %arg7: memref<3x8x1xf32, #tpu.memory_space<vmem>>, %arg8: memref<3x8x1xf32, #tpu.memory_space<vmem>>, %arg9: memref<8x128xf32, #tpu.memory_space<vmem>>) attributes {dimension_semantics = [], scalar_prefetch = 0 : i64, scratch_operands = 0 : i64, tpu.core_type = #tpu.core_type<tc>} {
    %c0 = arith.constant 0 : index
    %c0_0 = arith.constant 0 : index
    %0 = vector.load %arg0[%c0, %c0_0] : memref<8x128xf32, #tpu.memory_space<vmem>>, vector<8x128xf32>
    %c0_1 = arith.constant 0 : index
    %c0_2 = arith.constant 0 : index
    %1 = vector.load %arg4[%c0_1, %c0_2] : memref<10x8xf32, #tpu.memory_space<vmem>>, vector<10x8xf32>
    %cst = arith.constant dense<0.000000e+00> : vector<10x128xf32>
    %2 = tpu.matmul %1, %0, %cst {dimension_numbers = #tpu.dot_dimension_numbers<[1], [0], [0], [1], [0, 0, 1, 1], [], []>} : vector<10x8xf32>, vector<8x128xf32>, vector<10x128xf32> -> vector<10x128xf32>
    %c0_3 = arith.constant 0 : index
    %c0_4 = arith.constant 0 : index
    %3 = vector.load %arg5[%c0_3, %c0_4] : memref<10x1xf32, #tpu.memory_space<vmem>>, vector<10x1xf32>
    %4 = vector.broadcast %3 : vector<10x1xf32> to vector<10x128xf32>
    %5 = arith.addf %2, %4 : vector<10x128xf32>
    %6 = vector.extract_strided_slice %5 {offsets = [0, 0], sizes = [8, 128], strides = [1, 1]} : vector<10x128xf32> to vector<8x128xf32>
    %7 = vector.extract_strided_slice %5 {offsets = [8, 0], sizes = [1, 128], strides = [1, 1]} : vector<10x128xf32> to vector<1x128xf32>
    %8 = vector.extract_strided_slice %5 {offsets = [9, 0], sizes = [1, 128], strides = [1, 1]} : vector<10x128xf32> to vector<1x128xf32>
    %c0_5 = arith.constant 0 : index
    %c0_6 = arith.constant 0 : index
    %9 = vector.load %arg2[%c0_5, %c0_6] : memref<8x200xf32, #tpu.memory_space<vmem>>, vector<8x200xf32>
    %c0_7 = arith.constant 0 : index
    %c0_8 = arith.constant 0 : index
    %10 = vector.load %arg3[%c0_7, %c0_8] : memref<8x1xf32, #tpu.memory_space<vmem>>, vector<8x1xf32>
    %c0_9 = arith.constant 0 : index
    %c0_10 = arith.constant 0 : index
    %11 = vector.load %arg6[%c0_9, %c0_10] : memref<10x8xf32, #tpu.memory_space<vmem>>, vector<10x8xf32>
    %12 = tpu.iota {dimensions = array<i32: 1>} : vector<1x128xi32>
    %c0_11 = arith.constant 0 : index
    %c0_12 = arith.constant 0 : index
    %13 = vector.load %arg1[%c0_11, %c0_12] : memref<8x1xf32, #tpu.memory_space<vmem>>, vector<8x1xf32>
    %14 = vector.shape_cast %13 : vector<8x1xf32> to vector<8x1xf32>
    %15 = vector.broadcast %14 : vector<8x1xf32> to vector<8x128xf32>
    %c12_i32 = arith.constant 12 : i32
    %16 = vector.broadcast %c12_i32 : i32 to vector<1x128xi32>
    %17 = arith.cmpi sge, %12, %16 : vector<1x128xi32>
    %c44_i32 = arith.constant 44 : i32
    %18 = vector.broadcast %c44_i32 : i32 to vector<1x128xi32>
    %19 = arith.cmpi slt, %12, %18 : vector<1x128xi32>
    %20 = arith.andi %17, %19 : vector<1x128xi1>
    %c68_i32 = arith.constant 68 : i32
    %21 = vector.broadcast %c68_i32 : i32 to vector<1x128xi32>
    %22 = arith.cmpi sge, %12, %21 : vector<1x128xi32>
    %c100_i32 = arith.constant 100 : i32
    %23 = vector.broadcast %c100_i32 : i32 to vector<1x128xi32>
    %24 = arith.cmpi slt, %12, %23 : vector<1x128xi32>
    %25 = arith.andi %22, %24 : vector<1x128xi1>
    %26 = arith.ori %20, %25 : vector<1x128xi1>
    %cst_13 = arith.constant 0.000000e+00 : f32
    %27 = vector.shape_cast %26 : vector<1x128xi1> to vector<1x128xi1>
    %28 = vector.broadcast %27 : vector<1x128xi1> to vector<8x128xi1>
    %29 = vector.broadcast %cst_13 : f32 to vector<8x128xf32>
    %30 = arith.select %28, %15, %29 : vector<8x128xi1>, vector<8x128xf32>
    %c12_i32_14 = arith.constant 12 : i32
    %31 = tpu.dynamic_rotate %30 by %c12_i32_14 dim 1 : vector<8x128xf32>, i32 -> vector<8x128xf32>
    %c11_i32 = arith.constant 11 : i32
    %32 = tpu.dynamic_rotate %30 by %c11_i32 dim 1 : vector<8x128xf32>, i32 -> vector<8x128xf32>
    %c10_i32 = arith.constant 10 : i32
    %33 = tpu.dynamic_rotate %30 by %c10_i32 dim 1 : vector<8x128xf32>, i32 -> vector<8x128xf32>
    %c9_i32 = arith.constant 9 : i32
    %34 = tpu.dynamic_rotate %30 by %c9_i32 dim 1 : vector<8x128xf32>, i32 -> vector<8x128xf32>
    %c8_i32 = arith.constant 8 : i32
    %35 = tpu.dynamic_rotate %30 by %c8_i32 dim 1 : vector<8x128xf32>, i32 -> vector<8x128xf32>
    %c7_i32 = arith.constant 7 : i32
    %36 = tpu.dynamic_rotate %30 by %c7_i32 dim 1 : vector<8x128xf32>, i32 -> vector<8x128xf32>
    %c6_i32 = arith.constant 6 : i32
    %37 = tpu.dynamic_rotate %30 by %c6_i32 dim 1 : vector<8x128xf32>, i32 -> vector<8x128xf32>
    %c5_i32 = arith.constant 5 : i32
    %38 = tpu.dynamic_rotate %30 by %c5_i32 dim 1 : vector<8x128xf32>, i32 -> vector<8x128xf32>
    %c4_i32 = arith.constant 4 : i32
    %39 = tpu.dynamic_rotate %30 by %c4_i32 dim 1 : vector<8x128xf32>, i32 -> vector<8x128xf32>
    %c3_i32 = arith.constant 3 : i32
    %40 = tpu.dynamic_rotate %30 by %c3_i32 dim 1 : vector<8x128xf32>, i32 -> vector<8x128xf32>
    %c2_i32 = arith.constant 2 : i32
    %41 = tpu.dynamic_rotate %30 by %c2_i32 dim 1 : vector<8x128xf32>, i32 -> vector<8x128xf32>
    %c1_i32 = arith.constant 1 : i32
    %42 = tpu.dynamic_rotate %30 by %c1_i32 dim 1 : vector<8x128xf32>, i32 -> vector<8x128xf32>
    %c127_i32 = arith.constant 127 : i32
    %43 = tpu.dynamic_rotate %30 by %c127_i32 dim 1 : vector<8x128xf32>, i32 -> vector<8x128xf32>
    %c126_i32 = arith.constant 126 : i32
    %44 = tpu.dynamic_rotate %30 by %c126_i32 dim 1 : vector<8x128xf32>, i32 -> vector<8x128xf32>
    %c125_i32 = arith.constant 125 : i32
    %45 = tpu.dynamic_rotate %30 by %c125_i32 dim 1 : vector<8x128xf32>, i32 -> vector<8x128xf32>
    %c124_i32 = arith.constant 124 : i32
    %46 = tpu.dynamic_rotate %30 by %c124_i32 dim 1 : vector<8x128xf32>, i32 -> vector<8x128xf32>
    %c123_i32 = arith.constant 123 : i32
    %47 = tpu.dynamic_rotate %30 by %c123_i32 dim 1 : vector<8x128xf32>, i32 -> vector<8x128xf32>
    %c122_i32 = arith.constant 122 : i32
    %48 = tpu.dynamic_rotate %30 by %c122_i32 dim 1 : vector<8x128xf32>, i32 -> vector<8x128xf32>
    %c121_i32 = arith.constant 121 : i32
    %49 = tpu.dynamic_rotate %30 by %c121_i32 dim 1 : vector<8x128xf32>, i32 -> vector<8x128xf32>
    %c120_i32 = arith.constant 120 : i32
    %50 = tpu.dynamic_rotate %30 by %c120_i32 dim 1 : vector<8x128xf32>, i32 -> vector<8x128xf32>
    %c119_i32 = arith.constant 119 : i32
    %51 = tpu.dynamic_rotate %30 by %c119_i32 dim 1 : vector<8x128xf32>, i32 -> vector<8x128xf32>
    %c118_i32 = arith.constant 118 : i32
    %52 = tpu.dynamic_rotate %30 by %c118_i32 dim 1 : vector<8x128xf32>, i32 -> vector<8x128xf32>
    %c117_i32 = arith.constant 117 : i32
    %53 = tpu.dynamic_rotate %30 by %c117_i32 dim 1 : vector<8x128xf32>, i32 -> vector<8x128xf32>
    %c116_i32 = arith.constant 116 : i32
    %54 = tpu.dynamic_rotate %30 by %c116_i32 dim 1 : vector<8x128xf32>, i32 -> vector<8x128xf32>
    %55 = tpu.concatenate %31, %32, %33, %34, %35, %36, %37, %38, %39, %40, %41, %42, %30, %43, %44, %45 in 0 : vector<8x128xf32>, vector<8x128xf32>, vector<8x128xf32>, vector<8x128xf32>, vector<8x128xf32>, vector<8x128xf32>, vector<8x128xf32>, vector<8x128xf32>, vector<8x128xf32>, vector<8x128xf32>, vector<8x128xf32>, vector<8x128xf32>, vector<8x128xf32>, vector<8x128xf32>, vector<8x128xf32>, vector<8x128xf32> -> vector<128x128xf32>
    %56 = tpu.concatenate %46, %47, %48, %49, %50, %51, %52, %53, %54 in 0 : vector<8x128xf32>, vector<8x128xf32>, vector<8x128xf32>, vector<8x128xf32>, vector<8x128xf32>, vector<8x128xf32>, vector<8x128xf32>, vector<8x128xf32>, vector<8x128xf32> -> vector<72x128xf32>
    %57 = tpu.concatenate %55, %56 in 0 : vector<128x128xf32>, vector<72x128xf32> -> vector<200x128xf32>
    %cst_15 = arith.constant dense<0.000000e+00> : vector<8x128xf32>
    %58 = tpu.matmul %9, %57, %cst_15 {dimension_numbers = #tpu.dot_dimension_numbers<[1], [0], [0], [1], [0, 0, 1, 1], [], []>} : vector<8x200xf32>, vector<200x128xf32>, vector<8x128xf32> -> vector<8x128xf32>
    %59 = vector.broadcast %10 : vector<8x1xf32> to vector<8x128xf32>
    %60 = arith.addf %58, %59 : vector<8x128xf32>
    %cst_16 = arith.constant 0.000000e+00 : f32
    %61 = vector.broadcast %cst_16 : f32 to vector<8x128xf32>
    %62 = arith.maximumf %60, %61 : vector<8x128xf32>
    %cst_17 = arith.constant dense<0.000000e+00> : vector<10x128xf32>
    %63 = tpu.matmul %11, %62, %cst_17 {dimension_numbers = #tpu.dot_dimension_numbers<[1], [0], [0], [1], [0, 0, 1, 1], [], []>} : vector<10x8xf32>, vector<8x128xf32>, vector<10x128xf32> -> vector<10x128xf32>
    %64 = vector.extract_strided_slice %63 {offsets = [8, 0], sizes = [1, 128], strides = [1, 1]} : vector<10x128xf32> to vector<1x128xf32>
    %65 = arith.addf %7, %64 : vector<1x128xf32>
    %66 = arith.negf %65 : vector<1x128xf32>
    %67 = math.exp %66 : vector<1x128xf32>
    %cst_18 = arith.constant 1.000000e+00 : f32
    %68 = vector.broadcast %cst_18 : f32 to vector<1x128xf32>
    %69 = arith.addf %68, %67 : vector<1x128xf32>
    %70 = arith.divf %68, %69 : vector<1x128xf32>
    %71 = vector.extract_strided_slice %63 {offsets = [9, 0], sizes = [1, 128], strides = [1, 1]} : vector<10x128xf32> to vector<1x128xf32>
    %72 = arith.addf %8, %71 : vector<1x128xf32>
    %73 = arith.negf %72 : vector<1x128xf32>
    %74 = math.exp %73 : vector<1x128xf32>
    %cst_19 = arith.constant 1.000000e+00 : f32
    %75 = vector.broadcast %cst_19 : f32 to vector<1x128xf32>
    %76 = arith.addf %75, %74 : vector<1x128xf32>
    %77 = arith.divf %75, %76 : vector<1x128xf32>
    %78 = vector.extract_strided_slice %63 {offsets = [0, 0], sizes = [8, 128], strides = [1, 1]} : vector<10x128xf32> to vector<8x128xf32>
    %79 = vector.broadcast %77 : vector<1x128xf32> to vector<8x128xf32>
    %80 = arith.mulf %78, %79 : vector<8x128xf32>
    %81 = arith.addf %6, %80 : vector<8x128xf32>
    %82 = math.tanh %81 : vector<8x128xf32>
    %cst_20 = arith.constant 1.000000e+00 : f32
    %83 = vector.broadcast %cst_20 : f32 to vector<1x128xf32>
    %84 = arith.subf %83, %70 : vector<1x128xf32>
    %85 = vector.broadcast %84 : vector<1x128xf32> to vector<8x128xf32>
    %86 = arith.mulf %85, %62 : vector<8x128xf32>
    %87 = vector.broadcast %70 : vector<1x128xf32> to vector<8x128xf32>
    %88 = arith.mulf %87, %82 : vector<8x128xf32>
    %89 = arith.addf %86, %88 : vector<8x128xf32>
    %c12_i32_21 = arith.constant 12 : i32
    %90 = vector.broadcast %c12_i32_21 : i32 to vector<1x128xi32>
    %91 = arith.cmpi sge, %12, %90 : vector<1x128xi32>
    %c43_i32 = arith.constant 43 : i32
    %92 = vector.broadcast %c43_i32 : i32 to vector<1x128xi32>
    %93 = arith.cmpi slt, %12, %92 : vector<1x128xi32>
    %94 = arith.andi %91, %93 : vector<1x128xi1>
    %c68_i32_22 = arith.constant 68 : i32
    %95 = vector.broadcast %c68_i32_22 : i32 to vector<1x128xi32>
    %96 = arith.cmpi sge, %12, %95 : vector<1x128xi32>
    %c99_i32 = arith.constant 99 : i32
    %97 = vector.broadcast %c99_i32 : i32 to vector<1x128xi32>
    %98 = arith.cmpi slt, %12, %97 : vector<1x128xi32>
    %99 = arith.andi %96, %98 : vector<1x128xi1>
    %100 = arith.ori %94, %99 : vector<1x128xi1>
    %cst_23 = arith.constant 0.000000e+00 : f32
    %101 = vector.shape_cast %100 : vector<1x128xi1> to vector<1x128xi1>
    %102 = vector.broadcast %101 : vector<1x128xi1> to vector<8x128xi1>
    %103 = vector.broadcast %cst_23 : f32 to vector<8x128xf32>
    %104 = arith.select %102, %89, %103 : vector<8x128xi1>, vector<8x128xf32>
    %cst_24 = arith.constant dense<0.000000e+00> : vector<8xf32>
    %105 = vector.multi_reduction <add>, %104, %cst_24 [1] : vector<8x128xf32> to vector<8xf32>
    %106 = vector.shape_cast %105 : vector<8xf32> to vector<8x1xf32>
    %cst_25 = arith.constant 0.0161290318 : f32
    %107 = vector.broadcast %cst_25 : f32 to vector<8x1xf32>
    %108 = arith.mulf %106, %107 : vector<8x1xf32>
    %109 = arith.mulf %104, %104 : vector<8x128xf32>
    %cst_26 = arith.constant dense<0.000000e+00> : vector<8xf32>
    %110 = vector.multi_reduction <add>, %109, %cst_26 [1] : vector<8x128xf32> to vector<8xf32>
    %111 = vector.shape_cast %110 : vector<8xf32> to vector<8x1xf32>
    %cst_27 = arith.constant 0.0161290318 : f32
    %112 = vector.broadcast %cst_27 : f32 to vector<8x1xf32>
    %113 = arith.mulf %111, %112 : vector<8x1xf32>
    %114 = arith.mulf %108, %108 : vector<8x1xf32>
    %115 = arith.subf %113, %114 : vector<8x1xf32>
    %cst_28 = arith.constant 9.99999974E-6 : f32
    %116 = vector.broadcast %cst_28 : f32 to vector<8x1xf32>
    %117 = arith.addf %115, %116 : vector<8x1xf32>
    %118 = math.rsqrt %117 : vector<8x1xf32>
    %c0_29 = arith.constant 0 : index
    %c0_30 = arith.constant 0 : index
    %c0_31 = arith.constant 0 : index
    %119 = vector.load %arg7[%c0_29, %c0_30, %c0_31] : memref<3x8x1xf32, #tpu.memory_space<vmem>>, vector<1x8x1xf32>
    %120 = vector.shape_cast %119 : vector<1x8x1xf32> to vector<8x1xf32>
    %121 = arith.mulf %118, %120 : vector<8x1xf32>
    %122 = vector.broadcast %108 : vector<8x1xf32> to vector<8x128xf32>
    %123 = arith.subf %104, %122 : vector<8x128xf32>
    %124 = vector.broadcast %121 : vector<8x1xf32> to vector<8x128xf32>
    %125 = arith.mulf %123, %124 : vector<8x128xf32>
    %c0_32 = arith.constant 0 : index
    %c0_33 = arith.constant 0 : index
    %c0_34 = arith.constant 0 : index
    %126 = vector.load %arg8[%c0_32, %c0_33, %c0_34] : memref<3x8x1xf32, #tpu.memory_space<vmem>>, vector<1x8x1xf32>
    %127 = vector.shape_cast %126 : vector<1x8x1xf32> to vector<8x1xf32>
    %128 = vector.broadcast %127 : vector<8x1xf32> to vector<8x128xf32>
    %129 = arith.addf %125, %128 : vector<8x128xf32>
    %c1_i32_35 = arith.constant 1 : i32
    %130 = tpu.dynamic_rotate %129 by %c1_i32_35 dim 1 : vector<8x128xf32>, i32 -> vector<8x128xf32>
    %c13_i32 = arith.constant 13 : i32
    %131 = vector.broadcast %c13_i32 : i32 to vector<1x128xi32>
    %132 = arith.cmpi sge, %12, %131 : vector<1x128xi32>
    %c44_i32_36 = arith.constant 44 : i32
    %133 = vector.broadcast %c44_i32_36 : i32 to vector<1x128xi32>
    %134 = arith.cmpi slt, %12, %133 : vector<1x128xi32>
    %135 = arith.andi %132, %134 : vector<1x128xi1>
    %c69_i32 = arith.constant 69 : i32
    %136 = vector.broadcast %c69_i32 : i32 to vector<1x128xi32>
    %137 = arith.cmpi sge, %12, %136 : vector<1x128xi32>
    %c100_i32_37 = arith.constant 100 : i32
    %138 = vector.broadcast %c100_i32_37 : i32 to vector<1x128xi32>
    %139 = arith.cmpi slt, %12, %138 : vector<1x128xi32>
    %140 = arith.andi %137, %139 : vector<1x128xi1>
    %141 = arith.ori %135, %140 : vector<1x128xi1>
    %cst_38 = arith.constant 0.000000e+00 : f32
    %142 = vector.shape_cast %141 : vector<1x128xi1> to vector<1x128xi1>
    %143 = vector.broadcast %142 : vector<1x128xi1> to vector<8x128xi1>
    %144 = vector.broadcast %cst_38 : f32 to vector<8x128xf32>
    %145 = arith.select %143, %130, %144 : vector<8x128xi1>, vector<8x128xf32>
    %c12_i32_39 = arith.constant 12 : i32
    %146 = tpu.dynamic_rotate %145 by %c12_i32_39 dim 1 : vector<8x128xf32>, i32 -> vector<8x128xf32>
    %c11_i32_40 = arith.constant 11 : i32
    %147 = tpu.dynamic_rotate %145 by %c11_i32_40 dim 1 : vector<8x128xf32>, i32 -> vector<8x128xf32>
    %c10_i32_41 = arith.constant 10 : i32
    %148 = tpu.dynamic_rotate %145 by %c10_i32_41 dim 1 : vector<8x128xf32>, i32 -> vector<8x128xf32>
    %c9_i32_42 = arith.constant 9 : i32
    %149 = tpu.dynamic_rotate %145 by %c9_i32_42 dim 1 : vector<8x128xf32>, i32 -> vector<8x128xf32>
    %c8_i32_43 = arith.constant 8 : i32
    %150 = tpu.dynamic_rotate %145 by %c8_i32_43 dim 1 : vector<8x128xf32>, i32 -> vector<8x128xf32>
    %c7_i32_44 = arith.constant 7 : i32
    %151 = tpu.dynamic_rotate %145 by %c7_i32_44 dim 1 : vector<8x128xf32>, i32 -> vector<8x128xf32>
    %c6_i32_45 = arith.constant 6 : i32
    %152 = tpu.dynamic_rotate %145 by %c6_i32_45 dim 1 : vector<8x128xf32>, i32 -> vector<8x128xf32>
    %c5_i32_46 = arith.constant 5 : i32
    %153 = tpu.dynamic_rotate %145 by %c5_i32_46 dim 1 : vector<8x128xf32>, i32 -> vector<8x128xf32>
    %c4_i32_47 = arith.constant 4 : i32
    %154 = tpu.dynamic_rotate %145 by %c4_i32_47 dim 1 : vector<8x128xf32>, i32 -> vector<8x128xf32>
    %c3_i32_48 = arith.constant 3 : i32
    %155 = tpu.dynamic_rotate %145 by %c3_i32_48 dim 1 : vector<8x128xf32>, i32 -> vector<8x128xf32>
    %c2_i32_49 = arith.constant 2 : i32
    %156 = tpu.dynamic_rotate %145 by %c2_i32_49 dim 1 : vector<8x128xf32>, i32 -> vector<8x128xf32>
    %c1_i32_50 = arith.constant 1 : i32
    %157 = tpu.dynamic_rotate %145 by %c1_i32_50 dim 1 : vector<8x128xf32>, i32 -> vector<8x128xf32>
    %c127_i32_51 = arith.constant 127 : i32
    %158 = tpu.dynamic_rotate %145 by %c127_i32_51 dim 1 : vector<8x128xf32>, i32 -> vector<8x128xf32>
    %c126_i32_52 = arith.constant 126 : i32
    %159 = tpu.dynamic_rotate %145 by %c126_i32_52 dim 1 : vector<8x128xf32>, i32 -> vector<8x128xf32>
    %c125_i32_53 = arith.constant 125 : i32
    %160 = tpu.dynamic_rotate %145 by %c125_i32_53 dim 1 : vector<8x128xf32>, i32 -> vector<8x128xf32>
    %c124_i32_54 = arith.constant 124 : i32
    %161 = tpu.dynamic_rotate %145 by %c124_i32_54 dim 1 : vector<8x128xf32>, i32 -> vector<8x128xf32>
    %c123_i32_55 = arith.constant 123 : i32
    %162 = tpu.dynamic_rotate %145 by %c123_i32_55 dim 1 : vector<8x128xf32>, i32 -> vector<8x128xf32>
    %c122_i32_56 = arith.constant 122 : i32
    %163 = tpu.dynamic_rotate %145 by %c122_i32_56 dim 1 : vector<8x128xf32>, i32 -> vector<8x128xf32>
    %c121_i32_57 = arith.constant 121 : i32
    %164 = tpu.dynamic_rotate %145 by %c121_i32_57 dim 1 : vector<8x128xf32>, i32 -> vector<8x128xf32>
    %c120_i32_58 = arith.constant 120 : i32
    %165 = tpu.dynamic_rotate %145 by %c120_i32_58 dim 1 : vector<8x128xf32>, i32 -> vector<8x128xf32>
    %c119_i32_59 = arith.constant 119 : i32
    %166 = tpu.dynamic_rotate %145 by %c119_i32_59 dim 1 : vector<8x128xf32>, i32 -> vector<8x128xf32>
    %c118_i32_60 = arith.constant 118 : i32
    %167 = tpu.dynamic_rotate %145 by %c118_i32_60 dim 1 : vector<8x128xf32>, i32 -> vector<8x128xf32>
    %c117_i32_61 = arith.constant 117 : i32
    %168 = tpu.dynamic_rotate %145 by %c117_i32_61 dim 1 : vector<8x128xf32>, i32 -> vector<8x128xf32>
    %c116_i32_62 = arith.constant 116 : i32
    %169 = tpu.dynamic_rotate %145 by %c116_i32_62 dim 1 : vector<8x128xf32>, i32 -> vector<8x128xf32>
    %170 = tpu.concatenate %146, %147, %148, %149, %150, %151, %152, %153, %154, %155, %156, %157, %145, %158, %159, %160 in 0 : vector<8x128xf32>, vector<8x128xf32>, vector<8x128xf32>, vector<8x128xf32>, vector<8x128xf32>, vector<8x128xf32>, vector<8x128xf32>, vector<8x128xf32>, vector<8x128xf32>, vector<8x128xf32>, vector<8x128xf32>, vector<8x128xf32>, vector<8x128xf32>, vector<8x128xf32>, vector<8x128xf32>, vector<8x128xf32> -> vector<128x128xf32>
    %171 = tpu.concatenate %161, %162, %163, %164, %165, %166, %167, %168, %169 in 0 : vector<8x128xf32>, vector<8x128xf32>, vector<8x128xf32>, vector<8x128xf32>, vector<8x128xf32>, vector<8x128xf32>, vector<8x128xf32>, vector<8x128xf32>, vector<8x128xf32> -> vector<72x128xf32>
    %172 = tpu.concatenate %170, %171 in 0 : vector<128x128xf32>, vector<72x128xf32> -> vector<200x128xf32>
    %cst_63 = arith.constant dense<0.000000e+00> : vector<8x128xf32>
    %173 = tpu.matmul %9, %172, %cst_63 {dimension_numbers = #tpu.dot_dimension_numbers<[1], [0], [0], [1], [0, 0, 1, 1], [], []>} : vector<8x200xf32>, vector<200x128xf32>, vector<8x128xf32> -> vector<8x128xf32>
    %174 = vector.broadcast %10 : vector<8x1xf32> to vector<8x128xf32>
    %175 = arith.addf %173, %174 : vector<8x128xf32>
    %cst_64 = arith.constant 0.000000e+00 : f32
    %176 = vector.broadcast %cst_64 : f32 to vector<8x128xf32>
    %177 = arith.maximumf %175, %176 : vector<8x128xf32>
    %cst_65 = arith.constant dense<0.000000e+00> : vector<10x128xf32>
    %178 = tpu.matmul %11, %177, %cst_65 {dimension_numbers = #tpu.dot_dimension_numbers<[1], [0], [0], [1], [0, 0, 1, 1], [], []>} : vector<10x8xf32>, vector<8x128xf32>, vector<10x128xf32> -> vector<10x128xf32>
    %179 = vector.extract_strided_slice %178 {offsets = [8, 0], sizes = [1, 128], strides = [1, 1]} : vector<10x128xf32> to vector<1x128xf32>
    %180 = arith.addf %7, %179 : vector<1x128xf32>
    %181 = arith.negf %180 : vector<1x128xf32>
    %182 = math.exp %181 : vector<1x128xf32>
    %cst_66 = arith.constant 1.000000e+00 : f32
    %183 = vector.broadcast %cst_66 : f32 to vector<1x128xf32>
    %184 = arith.addf %183, %182 : vector<1x128xf32>
    %185 = arith.divf %183, %184 : vector<1x128xf32>
    %186 = vector.extract_strided_slice %178 {offsets = [9, 0], sizes = [1, 128], strides = [1, 1]} : vector<10x128xf32> to vector<1x128xf32>
    %187 = arith.addf %8, %186 : vector<1x128xf32>
    %188 = arith.negf %187 : vector<1x128xf32>
    %189 = math.exp %188 : vector<1x128xf32>
    %cst_67 = arith.constant 1.000000e+00 : f32
    %190 = vector.broadcast %cst_67 : f32 to vector<1x128xf32>
    %191 = arith.addf %190, %189 : vector<1x128xf32>
    %192 = arith.divf %190, %191 : vector<1x128xf32>
    %193 = vector.extract_strided_slice %178 {offsets = [0, 0], sizes = [8, 128], strides = [1, 1]} : vector<10x128xf32> to vector<8x128xf32>
    %194 = vector.broadcast %192 : vector<1x128xf32> to vector<8x128xf32>
    %195 = arith.mulf %193, %194 : vector<8x128xf32>
    %196 = arith.addf %6, %195 : vector<8x128xf32>
    %197 = math.tanh %196 : vector<8x128xf32>
    %cst_68 = arith.constant 1.000000e+00 : f32
    %198 = vector.broadcast %cst_68 : f32 to vector<1x128xf32>
    %199 = arith.subf %198, %185 : vector<1x128xf32>
    %200 = vector.broadcast %199 : vector<1x128xf32> to vector<8x128xf32>
    %201 = arith.mulf %200, %177 : vector<8x128xf32>
    %202 = vector.broadcast %185 : vector<1x128xf32> to vector<8x128xf32>
    %203 = arith.mulf %202, %197 : vector<8x128xf32>
    %204 = arith.addf %201, %203 : vector<8x128xf32>
    %c13_i32_69 = arith.constant 13 : i32
    %205 = vector.broadcast %c13_i32_69 : i32 to vector<1x128xi32>
    %206 = arith.cmpi sge, %12, %205 : vector<1x128xi32>
    %c43_i32_70 = arith.constant 43 : i32
    %207 = vector.broadcast %c43_i32_70 : i32 to vector<1x128xi32>
    %208 = arith.cmpi slt, %12, %207 : vector<1x128xi32>
    %209 = arith.andi %206, %208 : vector<1x128xi1>
    %c69_i32_71 = arith.constant 69 : i32
    %210 = vector.broadcast %c69_i32_71 : i32 to vector<1x128xi32>
    %211 = arith.cmpi sge, %12, %210 : vector<1x128xi32>
    %c99_i32_72 = arith.constant 99 : i32
    %212 = vector.broadcast %c99_i32_72 : i32 to vector<1x128xi32>
    %213 = arith.cmpi slt, %12, %212 : vector<1x128xi32>
    %214 = arith.andi %211, %213 : vector<1x128xi1>
    %215 = arith.ori %209, %214 : vector<1x128xi1>
    %cst_73 = arith.constant 0.000000e+00 : f32
    %216 = vector.shape_cast %215 : vector<1x128xi1> to vector<1x128xi1>
    %217 = vector.broadcast %216 : vector<1x128xi1> to vector<8x128xi1>
    %218 = vector.broadcast %cst_73 : f32 to vector<8x128xf32>
    %219 = arith.select %217, %204, %218 : vector<8x128xi1>, vector<8x128xf32>
    %cst_74 = arith.constant dense<0.000000e+00> : vector<8xf32>
    %220 = vector.multi_reduction <add>, %219, %cst_74 [1] : vector<8x128xf32> to vector<8xf32>
    %221 = vector.shape_cast %220 : vector<8xf32> to vector<8x1xf32>
    %cst_75 = arith.constant 0.0166666675 : f32
    %222 = vector.broadcast %cst_75 : f32 to vector<8x1xf32>
    %223 = arith.mulf %221, %222 : vector<8x1xf32>
    %224 = arith.mulf %219, %219 : vector<8x128xf32>
    %cst_76 = arith.constant dense<0.000000e+00> : vector<8xf32>
    %225 = vector.multi_reduction <add>, %224, %cst_76 [1] : vector<8x128xf32> to vector<8xf32>
    %226 = vector.shape_cast %225 : vector<8xf32> to vector<8x1xf32>
    %cst_77 = arith.constant 0.0166666675 : f32
    %227 = vector.broadcast %cst_77 : f32 to vector<8x1xf32>
    %228 = arith.mulf %226, %227 : vector<8x1xf32>
    %229 = arith.mulf %223, %223 : vector<8x1xf32>
    %230 = arith.subf %228, %229 : vector<8x1xf32>
    %cst_78 = arith.constant 9.99999974E-6 : f32
    %231 = vector.broadcast %cst_78 : f32 to vector<8x1xf32>
    %232 = arith.addf %230, %231 : vector<8x1xf32>
    %233 = math.rsqrt %232 : vector<8x1xf32>
    %c1 = arith.constant 1 : index
    %c0_79 = arith.constant 0 : index
    %c0_80 = arith.constant 0 : index
    %234 = vector.load %arg7[%c1, %c0_79, %c0_80] : memref<3x8x1xf32, #tpu.memory_space<vmem>>, vector<1x8x1xf32>
    %235 = vector.shape_cast %234 : vector<1x8x1xf32> to vector<8x1xf32>
    %236 = arith.mulf %233, %235 : vector<8x1xf32>
    %237 = vector.broadcast %223 : vector<8x1xf32> to vector<8x128xf32>
    %238 = arith.subf %219, %237 : vector<8x128xf32>
    %239 = vector.broadcast %236 : vector<8x1xf32> to vector<8x128xf32>
    %240 = arith.mulf %238, %239 : vector<8x128xf32>
    %c1_81 = arith.constant 1 : index
    %c0_82 = arith.constant 0 : index
    %c0_83 = arith.constant 0 : index
    %241 = vector.load %arg8[%c1_81, %c0_82, %c0_83] : memref<3x8x1xf32, #tpu.memory_space<vmem>>, vector<1x8x1xf32>
    %242 = vector.shape_cast %241 : vector<1x8x1xf32> to vector<8x1xf32>
    %243 = vector.broadcast %242 : vector<8x1xf32> to vector<8x128xf32>
    %244 = arith.addf %240, %243 : vector<8x128xf32>
    %c1_i32_84 = arith.constant 1 : i32
    %245 = tpu.dynamic_rotate %244 by %c1_i32_84 dim 1 : vector<8x128xf32>, i32 -> vector<8x128xf32>
    %c14_i32 = arith.constant 14 : i32
    %246 = vector.broadcast %c14_i32 : i32 to vector<1x128xi32>
    %247 = arith.cmpi sge, %12, %246 : vector<1x128xi32>
    %c44_i32_85 = arith.constant 44 : i32
    %248 = vector.broadcast %c44_i32_85 : i32 to vector<1x128xi32>
    %249 = arith.cmpi slt, %12, %248 : vector<1x128xi32>
    %250 = arith.andi %247, %249 : vector<1x128xi1>
    %c70_i32 = arith.constant 70 : i32
    %251 = vector.broadcast %c70_i32 : i32 to vector<1x128xi32>
    %252 = arith.cmpi sge, %12, %251 : vector<1x128xi32>
    %c100_i32_86 = arith.constant 100 : i32
    %253 = vector.broadcast %c100_i32_86 : i32 to vector<1x128xi32>
    %254 = arith.cmpi slt, %12, %253 : vector<1x128xi32>
    %255 = arith.andi %252, %254 : vector<1x128xi1>
    %256 = arith.ori %250, %255 : vector<1x128xi1>
    %cst_87 = arith.constant 0.000000e+00 : f32
    %257 = vector.shape_cast %256 : vector<1x128xi1> to vector<1x128xi1>
    %258 = vector.broadcast %257 : vector<1x128xi1> to vector<8x128xi1>
    %259 = vector.broadcast %cst_87 : f32 to vector<8x128xf32>
    %260 = arith.select %258, %245, %259 : vector<8x128xi1>, vector<8x128xf32>
    %c12_i32_88 = arith.constant 12 : i32
    %261 = tpu.dynamic_rotate %260 by %c12_i32_88 dim 1 : vector<8x128xf32>, i32 -> vector<8x128xf32>
    %c11_i32_89 = arith.constant 11 : i32
    %262 = tpu.dynamic_rotate %260 by %c11_i32_89 dim 1 : vector<8x128xf32>, i32 -> vector<8x128xf32>
    %c10_i32_90 = arith.constant 10 : i32
    %263 = tpu.dynamic_rotate %260 by %c10_i32_90 dim 1 : vector<8x128xf32>, i32 -> vector<8x128xf32>
    %c9_i32_91 = arith.constant 9 : i32
    %264 = tpu.dynamic_rotate %260 by %c9_i32_91 dim 1 : vector<8x128xf32>, i32 -> vector<8x128xf32>
    %c8_i32_92 = arith.constant 8 : i32
    %265 = tpu.dynamic_rotate %260 by %c8_i32_92 dim 1 : vector<8x128xf32>, i32 -> vector<8x128xf32>
    %c7_i32_93 = arith.constant 7 : i32
    %266 = tpu.dynamic_rotate %260 by %c7_i32_93 dim 1 : vector<8x128xf32>, i32 -> vector<8x128xf32>
    %c6_i32_94 = arith.constant 6 : i32
    %267 = tpu.dynamic_rotate %260 by %c6_i32_94 dim 1 : vector<8x128xf32>, i32 -> vector<8x128xf32>
    %c5_i32_95 = arith.constant 5 : i32
    %268 = tpu.dynamic_rotate %260 by %c5_i32_95 dim 1 : vector<8x128xf32>, i32 -> vector<8x128xf32>
    %c4_i32_96 = arith.constant 4 : i32
    %269 = tpu.dynamic_rotate %260 by %c4_i32_96 dim 1 : vector<8x128xf32>, i32 -> vector<8x128xf32>
    %c3_i32_97 = arith.constant 3 : i32
    %270 = tpu.dynamic_rotate %260 by %c3_i32_97 dim 1 : vector<8x128xf32>, i32 -> vector<8x128xf32>
    %c2_i32_98 = arith.constant 2 : i32
    %271 = tpu.dynamic_rotate %260 by %c2_i32_98 dim 1 : vector<8x128xf32>, i32 -> vector<8x128xf32>
    %c1_i32_99 = arith.constant 1 : i32
    %272 = tpu.dynamic_rotate %260 by %c1_i32_99 dim 1 : vector<8x128xf32>, i32 -> vector<8x128xf32>
    %c127_i32_100 = arith.constant 127 : i32
    %273 = tpu.dynamic_rotate %260 by %c127_i32_100 dim 1 : vector<8x128xf32>, i32 -> vector<8x128xf32>
    %c126_i32_101 = arith.constant 126 : i32
    %274 = tpu.dynamic_rotate %260 by %c126_i32_101 dim 1 : vector<8x128xf32>, i32 -> vector<8x128xf32>
    %c125_i32_102 = arith.constant 125 : i32
    %275 = tpu.dynamic_rotate %260 by %c125_i32_102 dim 1 : vector<8x128xf32>, i32 -> vector<8x128xf32>
    %c124_i32_103 = arith.constant 124 : i32
    %276 = tpu.dynamic_rotate %260 by %c124_i32_103 dim 1 : vector<8x128xf32>, i32 -> vector<8x128xf32>
    %c123_i32_104 = arith.constant 123 : i32
    %277 = tpu.dynamic_rotate %260 by %c123_i32_104 dim 1 : vector<8x128xf32>, i32 -> vector<8x128xf32>
    %c122_i32_105 = arith.constant 122 : i32
    %278 = tpu.dynamic_rotate %260 by %c122_i32_105 dim 1 : vector<8x128xf32>, i32 -> vector<8x128xf32>
    %c121_i32_106 = arith.constant 121 : i32
    %279 = tpu.dynamic_rotate %260 by %c121_i32_106 dim 1 : vector<8x128xf32>, i32 -> vector<8x128xf32>
    %c120_i32_107 = arith.constant 120 : i32
    %280 = tpu.dynamic_rotate %260 by %c120_i32_107 dim 1 : vector<8x128xf32>, i32 -> vector<8x128xf32>
    %c119_i32_108 = arith.constant 119 : i32
    %281 = tpu.dynamic_rotate %260 by %c119_i32_108 dim 1 : vector<8x128xf32>, i32 -> vector<8x128xf32>
    %c118_i32_109 = arith.constant 118 : i32
    %282 = tpu.dynamic_rotate %260 by %c118_i32_109 dim 1 : vector<8x128xf32>, i32 -> vector<8x128xf32>
    %c117_i32_110 = arith.constant 117 : i32
    %283 = tpu.dynamic_rotate %260 by %c117_i32_110 dim 1 : vector<8x128xf32>, i32 -> vector<8x128xf32>
    %c116_i32_111 = arith.constant 116 : i32
    %284 = tpu.dynamic_rotate %260 by %c116_i32_111 dim 1 : vector<8x128xf32>, i32 -> vector<8x128xf32>
    %285 = tpu.concatenate %261, %262, %263, %264, %265, %266, %267, %268, %269, %270, %271, %272, %260, %273, %274, %275 in 0 : vector<8x128xf32>, vector<8x128xf32>, vector<8x128xf32>, vector<8x128xf32>, vector<8x128xf32>, vector<8x128xf32>, vector<8x128xf32>, vector<8x128xf32>, vector<8x128xf32>, vector<8x128xf32>, vector<8x128xf32>, vector<8x128xf32>, vector<8x128xf32>, vector<8x128xf32>, vector<8x128xf32>, vector<8x128xf32> -> vector<128x128xf32>
    %286 = tpu.concatenate %276, %277, %278, %279, %280, %281, %282, %283, %284 in 0 : vector<8x128xf32>, vector<8x128xf32>, vector<8x128xf32>, vector<8x128xf32>, vector<8x128xf32>, vector<8x128xf32>, vector<8x128xf32>, vector<8x128xf32>, vector<8x128xf32> -> vector<72x128xf32>
    %287 = tpu.concatenate %285, %286 in 0 : vector<128x128xf32>, vector<72x128xf32> -> vector<200x128xf32>
    %cst_112 = arith.constant dense<0.000000e+00> : vector<8x128xf32>
    %288 = tpu.matmul %9, %287, %cst_112 {dimension_numbers = #tpu.dot_dimension_numbers<[1], [0], [0], [1], [0, 0, 1, 1], [], []>} : vector<8x200xf32>, vector<200x128xf32>, vector<8x128xf32> -> vector<8x128xf32>
    %289 = vector.broadcast %10 : vector<8x1xf32> to vector<8x128xf32>
    %290 = arith.addf %288, %289 : vector<8x128xf32>
    %cst_113 = arith.constant 0.000000e+00 : f32
    %291 = vector.broadcast %cst_113 : f32 to vector<8x128xf32>
    %292 = arith.maximumf %290, %291 : vector<8x128xf32>
    %cst_114 = arith.constant dense<0.000000e+00> : vector<10x128xf32>
    %293 = tpu.matmul %11, %292, %cst_114 {dimension_numbers = #tpu.dot_dimension_numbers<[1], [0], [0], [1], [0, 0, 1, 1], [], []>} : vector<10x8xf32>, vector<8x128xf32>, vector<10x128xf32> -> vector<10x128xf32>
    %294 = vector.extract_strided_slice %293 {offsets = [8, 0], sizes = [1, 128], strides = [1, 1]} : vector<10x128xf32> to vector<1x128xf32>
    %295 = arith.addf %7, %294 : vector<1x128xf32>
    %296 = arith.negf %295 : vector<1x128xf32>
    %297 = math.exp %296 : vector<1x128xf32>
    %cst_115 = arith.constant 1.000000e+00 : f32
    %298 = vector.broadcast %cst_115 : f32 to vector<1x128xf32>
    %299 = arith.addf %298, %297 : vector<1x128xf32>
    %300 = arith.divf %298, %299 : vector<1x128xf32>
    %301 = vector.extract_strided_slice %293 {offsets = [9, 0], sizes = [1, 128], strides = [1, 1]} : vector<10x128xf32> to vector<1x128xf32>
    %302 = arith.addf %8, %301 : vector<1x128xf32>
    %303 = arith.negf %302 : vector<1x128xf32>
    %304 = math.exp %303 : vector<1x128xf32>
    %cst_116 = arith.constant 1.000000e+00 : f32
    %305 = vector.broadcast %cst_116 : f32 to vector<1x128xf32>
    %306 = arith.addf %305, %304 : vector<1x128xf32>
    %307 = arith.divf %305, %306 : vector<1x128xf32>
    %308 = vector.extract_strided_slice %293 {offsets = [0, 0], sizes = [8, 128], strides = [1, 1]} : vector<10x128xf32> to vector<8x128xf32>
    %309 = vector.broadcast %307 : vector<1x128xf32> to vector<8x128xf32>
    %310 = arith.mulf %308, %309 : vector<8x128xf32>
    %311 = arith.addf %6, %310 : vector<8x128xf32>
    %312 = math.tanh %311 : vector<8x128xf32>
    %cst_117 = arith.constant 1.000000e+00 : f32
    %313 = vector.broadcast %cst_117 : f32 to vector<1x128xf32>
    %314 = arith.subf %313, %300 : vector<1x128xf32>
    %315 = vector.broadcast %314 : vector<1x128xf32> to vector<8x128xf32>
    %316 = arith.mulf %315, %292 : vector<8x128xf32>
    %317 = vector.broadcast %300 : vector<1x128xf32> to vector<8x128xf32>
    %318 = arith.mulf %317, %312 : vector<8x128xf32>
    %319 = arith.addf %316, %318 : vector<8x128xf32>
    %c14_i32_118 = arith.constant 14 : i32
    %320 = vector.broadcast %c14_i32_118 : i32 to vector<1x128xi32>
    %321 = arith.cmpi sge, %12, %320 : vector<1x128xi32>
    %c43_i32_119 = arith.constant 43 : i32
    %322 = vector.broadcast %c43_i32_119 : i32 to vector<1x128xi32>
    %323 = arith.cmpi slt, %12, %322 : vector<1x128xi32>
    %324 = arith.andi %321, %323 : vector<1x128xi1>
    %c70_i32_120 = arith.constant 70 : i32
    %325 = vector.broadcast %c70_i32_120 : i32 to vector<1x128xi32>
    %326 = arith.cmpi sge, %12, %325 : vector<1x128xi32>
    %c99_i32_121 = arith.constant 99 : i32
    %327 = vector.broadcast %c99_i32_121 : i32 to vector<1x128xi32>
    %328 = arith.cmpi slt, %12, %327 : vector<1x128xi32>
    %329 = arith.andi %326, %328 : vector<1x128xi1>
    %330 = arith.ori %324, %329 : vector<1x128xi1>
    %cst_122 = arith.constant 0.000000e+00 : f32
    %331 = vector.shape_cast %330 : vector<1x128xi1> to vector<1x128xi1>
    %332 = vector.broadcast %331 : vector<1x128xi1> to vector<8x128xi1>
    %333 = vector.broadcast %cst_122 : f32 to vector<8x128xf32>
    %334 = arith.select %332, %319, %333 : vector<8x128xi1>, vector<8x128xf32>
    %cst_123 = arith.constant dense<0.000000e+00> : vector<8xf32>
    %335 = vector.multi_reduction <add>, %334, %cst_123 [1] : vector<8x128xf32> to vector<8xf32>
    %336 = vector.shape_cast %335 : vector<8xf32> to vector<8x1xf32>
    %cst_124 = arith.constant 0.0172413792 : f32
    %337 = vector.broadcast %cst_124 : f32 to vector<8x1xf32>
    %338 = arith.mulf %336, %337 : vector<8x1xf32>
    %339 = arith.mulf %334, %334 : vector<8x128xf32>
    %cst_125 = arith.constant dense<0.000000e+00> : vector<8xf32>
    %340 = vector.multi_reduction <add>, %339, %cst_125 [1] : vector<8x128xf32> to vector<8xf32>
    %341 = vector.shape_cast %340 : vector<8xf32> to vector<8x1xf32>
    %cst_126 = arith.constant 0.0172413792 : f32
    %342 = vector.broadcast %cst_126 : f32 to vector<8x1xf32>
    %343 = arith.mulf %341, %342 : vector<8x1xf32>
    %344 = arith.mulf %338, %338 : vector<8x1xf32>
    %345 = arith.subf %343, %344 : vector<8x1xf32>
    %cst_127 = arith.constant 9.99999974E-6 : f32
    %346 = vector.broadcast %cst_127 : f32 to vector<8x1xf32>
    %347 = arith.addf %345, %346 : vector<8x1xf32>
    %348 = math.rsqrt %347 : vector<8x1xf32>
    %c2 = arith.constant 2 : index
    %c0_128 = arith.constant 0 : index
    %c0_129 = arith.constant 0 : index
    %349 = vector.load %arg7[%c2, %c0_128, %c0_129] : memref<3x8x1xf32, #tpu.memory_space<vmem>>, vector<1x8x1xf32>
    %350 = vector.shape_cast %349 : vector<1x8x1xf32> to vector<8x1xf32>
    %351 = arith.mulf %348, %350 : vector<8x1xf32>
    %352 = vector.broadcast %338 : vector<8x1xf32> to vector<8x128xf32>
    %353 = arith.subf %334, %352 : vector<8x128xf32>
    %354 = vector.broadcast %351 : vector<8x1xf32> to vector<8x128xf32>
    %355 = arith.mulf %353, %354 : vector<8x128xf32>
    %c2_130 = arith.constant 2 : index
    %c0_131 = arith.constant 0 : index
    %c0_132 = arith.constant 0 : index
    %356 = vector.load %arg8[%c2_130, %c0_131, %c0_132] : memref<3x8x1xf32, #tpu.memory_space<vmem>>, vector<1x8x1xf32>
    %357 = vector.shape_cast %356 : vector<1x8x1xf32> to vector<8x1xf32>
    %358 = vector.broadcast %357 : vector<8x1xf32> to vector<8x128xf32>
    %359 = arith.addf %355, %358 : vector<8x128xf32>
    %c0_133 = arith.constant 0 : index
    %c0_134 = arith.constant 0 : index
    %360 = vector.load %arg9[%c0_133, %c0_134] : memref<8x128xf32, #tpu.memory_space<vmem>>, vector<8x128xf32>
    tpu.vector_store %arg9[%c0_133, %c0_134], %359 {strides = array<i32>} : memref<8x128xf32, #tpu.memory_space<vmem>>, vector<8x128xf32>,
    return
  }
}

</mosaic_0001>

<bundles_post_ra>
// kernel: tpu_custom_call.1
= control target key start
LH: loop header
LB: loop body
LE: loop exit
PB: predicated region body
PF: predicated region fallthrough
CT: control target
= control target key end

     0   :  { %vm48_vm0 = vcmask 64512   ;;  %v1211_v3 = vmov 0   ;;  %s1663_s0 = inlined_call_operand.vmem [shape: f32[8,128], index: 0, kind: input, shape index: {}]   ;;  %s1664_s1 = inlined_call_operand.vmem [shape: f32[8,1], index: 1, kind: input, shape index: {}]   ;;  %s1665_s2 = inlined_call_operand.vmem [shape: f32[8,200], index: 2, kind: input, shape index: {}]   ;;  %s1666_s3 = inlined_call_operand.vmem [shape: f32[8,1], index: 3, kind: input, shape index: {}]   ;;  %s1667_s4 = inlined_call_operand.vmem [shape: f32[10,8], index: 4, kind: input, shape index: {}]   ;;  %s1668_s5 = inlined_call_operand.vmem [shape: f32[10,1], index: 5, kind: input, shape index: {}]   ;;  %s1669_s6 = inlined_call_operand.vmem [shape: f32[10,8], index: 6, kind: input, shape index: {}]   ;;  %s1670_s7 = inlined_call_operand.vmem [shape: f32[3,8,1], index: 7, kind: input, shape index: {}]   ;;  %s1671_s8 = inlined_call_operand.vmem [shape: f32[3,8,1], index: 8, kind: input, shape index: {}]   ;;  %s1672_s9 = inlined_call_operand.hbm [shape: f32[8,128], index: 9, kind: output, shape index: {}]  }
   0x1   :  { %v137_v0 = vld [vmem:[%s1664_s1] sm:$0xff]  ;;  %1161 = vset.pattern.permute.xlu0 %v1211_v3  ;;  %v35_v4 = vld [vmem:[%s1667_s4 + $0x8] sm:$0x3] }
   0x2   :  { %v33_v1 = vld [vmem:[%s1663_s0] sm:$0xff] }
   0x3   :  { %v34_v2 = vld [vmem:[%s1667_s4] sm:$0xff]  ;;  %1001 = vmatprep.subr.mxu0 %v33_v1 }
   0x4   :  { %14 = vsyncpa [#allocation3], 0  ;;  %140 = vperm.xlu0 %1161, %v137_v0   ;;  %1002 = vmatpush3.msra.mxu0 %v33_v1  ;;  %v135_v5 = vlaneseq  ;;  %v1212_v7 = vmov 0.0|0.0   ;;  %s1213_s0 = smov 11   ;;  %s1214_s1 = smov 12   ;;  %v1363_v12 = vld [vmem:[%s1665_s2 + $0x8] sm:$0xff] }
   0x5   :  { %1003 = vmatprep.mubr.msk.f32.mxu0 %vm48_vm0, %v34_v2  ;;  %1162 = vset.pattern.permute.xlu1 %v1211_v3  ;;  %s1215_s4 = smov 10   ;;  %s1216_s17 = smov 9   ;;  %vm206_vm8 = vcmask 588800   ;;  %v37_v13 = vld [vmem:[%s1668_s5 + $0x8] sm:$0x3]  ;;  %v132_v14 = vld [vmem:[%s1666_s3] sm:$0xff] }
   0x6   :  { %1004 = vmatmul.mubr.msk.f32.vlgmr.msra.gmra.mrb[0].mxu0 %vm48_vm0, %v35_v4  ;;  %v1305_v6 = vand.u32 127, %v135_v5  ;;  %1021 = vmatprep.subr.bf16.mxu1 %v1212_v7  ;;  %s1217_s18 = smov 8   ;;  %s1218_s19 = smov 7   ;;  %v36_v15 = vld [vmem:[%s1668_s5] sm:$0xff]  ;;  %vm1237_vm9 = vmmov 1   ;;  %v1238_v52 = vmov 0.0  }
   0x7   :  { %s1219_s20 = smov 6   ;;  %s1220_s21 = smov 5   ;;  %971 = vmatprep.mubr.msk.f32.mxu1 %vm206_vm8, %v1363_v12  ;;  %v1404_v53 = vld [vmem:[%s1665_s2] sm:$0xff]  ;;  %v1423_v62 = vld [vmem:[%s1669_s6 + $0x8] sm:$0x3] }
   0x8   :  { %vm143_vm1 = vcmp.ge.s32.totalorder %v1305_v6, 12  ;;  %vm144_vm2 = vcmp.lt.s32.totalorder %v1305_v6, 44  ;;  %vm146_vm3 = vcmp.ge.s32.totalorder %v1305_v6, 68  ;;  %vm147_vm4 = vcmp.lt.s32.totalorder %v1305_v6, 100  ;;  %s1221_s22 = smov 4   ;;  %s1222_s23 = smov 3  }
   0x9   :  { %vm1316_vm5 = vmand %vm143_vm1, %vm144_vm2  ;;  %s1223_s24 = smov 2   ;;  %s1224_s25 = smov 1   ;;  %v1413_v56 = vld [vmem:[%s1669_s6] sm:$0xff]  ;;  %vm388_vm11 = vcmp.lt.s32.totalorder %v1305_v6, 43  ;;  %vm390_vm12 = vcmp.lt.s32.totalorder %v1305_v6, 99 }
   0xa   :  { %vm1324_vm6 = vmand %vm146_vm3, %vm147_vm4  ;;  %s1225_s26 = smov 127   ;;  %s1226_s27 = smov 126   ;;  %1008 = vmatprep.mubr.msk.f32.mxu0 %vm48_vm0, %v1413_v56 }
   0xb   :  { %vm149_vm7 = vmor %vm1316_vm5, %vm1324_vm6  ;;  %s1683_s28 = smov 125   ;;  %s1228_s29 = smov 124  }
   0xc   :  { %s1673_s30 = smov 123   ;;  %s1679_s10 = smov 122   ;;  %vm1041_vm10 = vmpackc.low %vm1237_vm9, %vm149_vm7 }
   0xd   :  { %s1675_s11 = smov 121   ;;  %s1677_s12 = smov 120   ;;  %vm389_vm13 = vmand %vm143_vm1, %vm388_vm11  ;;  %vm425_vm1 = vcmp.ge.s32.totalorder %v1305_v6, 13 }
   0xe   :  { %s1681_s15 = smov 119   ;;  %s1234_s16 = smov 118   ;;  %vm391_vm14 = vmand %vm146_vm3, %vm390_vm12  ;;  %vm427_vm3 = vcmp.ge.s32.totalorder %v1305_v6, 69 }
   0xf   :  { %vm392_vm15 = vmor %vm389_vm13, %vm391_vm14  ;;  %s1693_s3 = smov 125   ;;  %s1694_s5 = smov 122  }
  0x10   :  { %vm1468_vm5 = vmand %vm425_vm1, %vm144_vm2  ;;  %s1697_s2 = smov 121  }
  0x11   :  { %vm1476_vm6 = vmand %vm427_vm3, %vm147_vm4 }
  0x12   :  { %vm654_vm13 = vmand %vm427_vm3, %vm390_vm12 }
  0x83   :  { %v1332_v10 = vpop.permute.xlu0 %140 }
  0x84   :  { %v152_v11 = vsel %vm149_vm7, %v1332_v10, 0.0  ;;  %vm429_vm7 = vmor %vm1468_vm5, %vm1476_vm6 }
  0x85   :  { %155 = vrot.lane.b32.xlu1 %v152_v11, %s1213_s0  ;;  %153 = vrot.lane.b32.xlu0 %v152_v11, %s1214_s1 }
  0x89   :  { %157 = vrot.lane.b32.xlu1 %v152_v11, %s1215_s4  ;;  %159 = vrot.lane.b32.xlu0 %v152_v11, %s1216_s17 }
  0x8d   :  { %161 = vrot.lane.b32.xlu1 %v152_v11, %s1217_s18  ;;  %163 = vrot.lane.b32.xlu0 %v152_v11, %s1218_s19 }
  0x91   :  { %165 = vrot.lane.b32.xlu1 %v152_v11, %s1219_s20  ;;  %167 = vrot.lane.b32.xlu0 %v152_v11, %s1220_s21 }
  0x95   :  { %169 = vrot.lane.b32.xlu1 %v152_v11, %s1221_s22  ;;  %171 = vrot.lane.b32.xlu0 %v152_v11, %s1222_s23 }
  0x99   :  { %173 = vrot.lane.b32.xlu1 %v152_v11, %s1223_s24  ;;  %175 = vrot.lane.b32.xlu0 %v152_v11, %s1224_s25 }
  0x9d   :  { %177 = vrot.lane.b32.xlu1 %v152_v11, %s1225_s26  ;;  %179 = vrot.lane.b32.xlu0 %v152_v11, %s1226_s27 }
  0xa1   :  { %181 = vrot.lane.b32.xlu1 %v152_v11, %s1683_s28  ;;  %183 = vrot.lane.b32.xlu0 %v152_v11, %s1228_s29  ;;  %s1695_s28 = smov 123  }
  0xa5   :  { %185 = vrot.lane.b32.xlu1 %v152_v11, %s1673_s30  ;;  %187 = vrot.lane.b32.xlu0 %v152_v11, %s1679_s10  ;;  %s1235_s30 = smov 117   ;;  %s1696_s10 = smov 120  }
  0xa9   :  { %189 = vrot.lane.b32.xlu1 %v152_v11, %s1675_s11  ;;  %191 = vrot.lane.b32.xlu0 %v152_v11, %s1677_s12  ;;  %s1236_s11 = smov 116   ;;  %s1698_s12 = smov 119  }
  0xad   :  { %193 = vrot.lane.b32.xlu1 %v152_v11, %s1681_s15  ;;  %195 = vrot.lane.b32.xlu0 %v152_v11, %s1234_s16 }
  0xb1   :  { %197 = vrot.lane.b32.xlu1 %v152_v11, %s1235_s30  ;;  %199 = vrot.lane.b32.xlu0 %v152_v11, %s1236_s11 }
  0xb5   :  { %45 = vperm.xlu0 %1161, %v37_v13   ;;  %203 = vperm.xlu1 %1162, %v132_v14  }
  0xb9   :  { %40 = vperm.xlu1 %1162, %v36_v15  }
  0xd9   :  { %v1380_v16 = vpop.f32.mrb[0].mxu0 }
  0xda   :  { %v121_v55 = vpop.f32.mrb[1].mxu0 }
  0xf7   :  { %v156_v17 = vpop.permute.xlu1 %155  ;;  %v154_v18 = vpop.permute.xlu0 %153 }
  0xf8   :  { %v1022_v19 = vpack.c.bf16 %v156_v17, %v154_v18 }
  0xfa   :  { %1023 = vmatpush1.bf16.msra.mxu1 %v1022_v19 }
  0xfb   :  { %v158_v20 = vpop.permute.xlu1 %157  ;;  %v160_v21 = vpop.permute.xlu0 %159  ;;  %1024 = vmatprep.subr.bf16.mxu1 %v1212_v7 }
  0xfc   :  { %v1025_v22 = vpack.c.bf16 %v160_v21, %v158_v20 }
  0xfe   :  { %1026 = vmatpush1.bf16.msra.mxu1 %v1025_v22 }
  0xff   :  { %v162_v23 = vpop.permute.xlu1 %161  ;;  %v164_v24 = vpop.permute.xlu0 %163  ;;  %1027 = vmatprep.subr.bf16.mxu1 %v1212_v7 }
 0x100   :  { %v1028_v25 = vpack.c.bf16 %v164_v24, %v162_v23 }
 0x102   :  { %1029 = vmatpush1.bf16.msra.mxu1 %v1028_v25 }
 0x103   :  { %v166_v26 = vpop.permute.xlu1 %165  ;;  %v168_v27 = vpop.permute.xlu0 %167  ;;  %1030 = vmatprep.subr.bf16.mxu1 %v1212_v7 }
 0x104   :  { %v1031_v28 = vpack.c.bf16 %v168_v27, %v166_v26  ;;  %v416_v27 = vld [vmem:[%s1671_s8] sm:$0xff] }
 0x106   :  { %1032 = vmatpush1.bf16.msra.mxu1 %v1031_v28 }
 0x107   :  { %v170_v29 = vpop.permute.xlu1 %169  ;;  %v172_v30 = vpop.permute.xlu0 %171  ;;  %1033 = vmatprep.subr.bf16.mxu1 %v1212_v7 }
 0x108   :  { %v1034_v31 = vpack.c.bf16 %v172_v30, %v170_v29 }
 0x10a   :  { %1035 = vmatpush1.bf16.msra.mxu1 %v1034_v31 }
 0x10b   :  { %v174_v32 = vpop.permute.xlu1 %173  ;;  %v176_v33 = vpop.permute.xlu0 %175  ;;  %1036 = vmatprep.subr.bf16.mxu1 %v1212_v7 }
 0x10c   :  { %v1037_v34 = vpack.c.bf16 %v176_v33, %v174_v32 }
 0x10e   :  { %1038 = vmatpush1.bf16.msra.mxu1 %v1037_v34 }
 0x10f   :  { %v178_v35 = vpop.permute.xlu1 %177  ;;  %v180_v36 = vpop.permute.xlu0 %179  ;;  %1039 = vmatprep.subr.bf16.mxu1 %v1212_v7 }
 0x110   :  { %v1040_v37 = vpack.c.bf16 %v178_v35, %v1332_v10  ;;  %v370_v10 = vshrl.u32 %v135_v5, 7  ;;  %v407_v35 = vld [vmem:[%s1670_s7] sm:$0xff] }
 0x112   :  { %1042 = vmatpush1.bf16.msk.msra.mxu1 %vm1041_vm10, %v1040_v37  ;;  %v1435_v11 = vsub.s32 1, %v370_v10  ;;  %v1441_v19 = vsub.s32 0, %v370_v10  ;;  %vm653_vm10 = vmand %vm425_vm1, %vm388_vm11  ;;  %vm692_vm1 = vcmp.ge.s32.totalorder %v1305_v6, 70 }
 0x113   :  { %v182_v38 = vpop.permute.xlu1 %181  ;;  %v184_v39 = vpop.permute.xlu0 %183  ;;  %1043 = vmatprep.subr.bf16.mxu1 %v1212_v7  ;;  %vm655_vm14 = vmor %vm653_vm10, %vm654_vm13 }
 0x114   :  { %v1044_v40 = vpack.c.bf16 %v182_v38, %v180_v36  ;;  %vm1573_vm5 = vmand %vm692_vm1, %vm147_vm4 }
 0x115   :  { %vm919_vm4 = vmand %vm692_vm1, %vm390_vm12 }
 0x116   :  { %1045 = vmatpush1.bf16.msra.mxu1 %v1044_v40 }
 0x117   :  { %v186_v41 = vpop.permute.xlu1 %185  ;;  %v188_v42 = vpop.permute.xlu0 %187  ;;  %1046 = vmatprep.subr.bf16.mxu1 %v1212_v7 }
 0x118   :  { %v1047_v43 = vpack.c.bf16 %v186_v41, %v184_v39 }
 0x11a   :  { %1048 = vmatpush1.bf16.msra.mxu1 %v1047_v43 }
 0x11b   :  { %v190_v44 = vpop.permute.xlu1 %189  ;;  %1049 = vmatprep.subr.bf16.mxu1 %v1212_v7  ;;  %v192_v46 = vpop.permute.xlu0 %191 }
 0x11c   :  { %v1050_v45 = vpack.c.bf16 %v190_v44, %v188_v42 }
 0x11e   :  { %1051 = vmatpush1.bf16.msra.mxu1 %v1050_v45 }
 0x11f   :  { %v194_v47 = vpop.permute.xlu1 %193  ;;  %1052 = vmatprep.subr.bf16.mxu1 %v1212_v7  ;;  %v196_v49 = vpop.permute.xlu0 %195 }
 0x120   :  { %v1053_v48 = vpack.c.bf16 %v194_v47, %v192_v46 }
 0x122   :  { %1054 = vmatpush1.bf16.msra.mxu1 %v1053_v48 }
 0x123   :  { %v198_v50 = vpop.permute.xlu1 %197  ;;  %1055 = vmatprep.subr.bf16.mxu1 %v1212_v7  ;;  %v200_v54 = vpop.permute.xlu0 %199 }
 0x124   :  { %v1056_v51 = vpack.c.bf16 %v198_v50, %v196_v49 }
 0x126   :  { %1057 = vmatpush1.bf16.msra.mxu1 %v1056_v51 }
 0x127   :  { %258 = vmatprep.subr.mxu1 %v1238_v52 }
 0x12a   :  { %259 = vmatpush1.msra.mxu1 %v200_v54 }
 0x12b   :  { %275 = vmatmul.mubr.f32.vlgmr.msra.gmra.mrb[0].mxu1 %v1404_v53  ;;  %1095 = vmatprep.subr.bf16.mxu1 %v1212_v7 }
 0x12c   :  { %983 = vmatprep.mubr.msk.f32.mxu1 %vm206_vm8, %v1363_v12 }
 0x134   :  { %v1417_v57 = vpop.permute.xlu1 %203  ;;  %v46_v63 = vpop.permute.xlu0 %45 }
 0x135   :  { %v1431_v0 = vadd.f32 %v1380_v16, %v46_v63 }
 0x138   :  { %v41_v14 = vpop.permute.xlu1 %40 }
 0x139   :  { %v1438_v15 = vadd.f32 %v121_v55, %v41_v14 }
 0x1fe   :  { %v276_v58 = vpop.f32.mrb[0].mxu1 }
 0x1ff   :  { %v277_v59 = vadd.f32 %v276_v58, %v1417_v57  ;;  %v278_v60 = vpop.f32.mrb[1].mxu1 }
 0x201   :  { %v280_v61 = vmax.f32 %v277_v59, 0.0 }
 0x203   :  { %1006 = vmatprep.subr.mxu0 %v280_v61 }
 0x204   :  { %1007 = vmatpush3.msra.mxu0 %v280_v61 }
 0x205   :  { %1009 = vmatmul.mubr.msk.f32.vlgmr.msra.gmra.mrb[2].mxu0 %vm48_vm0, %v1423_v62  ;;  %1058 = vmatprep.subr.bf16.mxu0 %v1212_v7 }
 0x206   :  { %976 = vmatprep.mubr.msk.f32.mxu0 %vm206_vm8, %v1363_v12  ;;  %vm1078_vm8 = vmpackc.low %vm1237_vm9, %vm429_vm7 }
 0x2d8   :  { %v1010_v1 = vpop.f32.mrb[2].mxu0 }
 0x2d9   :  { %v362_v2 = vadd.f32 %v1010_v1, %v1431_v0  ;;  %v353_v3 = vpop.f32.mrb[3].mxu0 }
 0x2db   :  { %v974_v4 = vmul.f32 -1.442695, %v362_v2 }
 0x2dd   :  { %1163 = vpow2.f32 %v974_v4 }
 0x2e7   :  { %v1164_v8 = vpop.eup %1163 }
 0x2e8   :  { %v366_v9 = vadd.f32 1.0, %v1164_v8 }
 0x2ea   :  { %1165 = vrcp.f32 %v366_v9 }
 0x2f4   :  { %v1166_v13 = vpop.eup %1165 }
 0x2f5   :  { %v372_v12 = vrot.slane %v1166_v13, %v1435_v11  ;;  %v376_v18 = vsub.f32 1.0, %v1166_v13  ;;  %v385_v20 = vrot.slane %v1166_v13, %v1441_v19 }
 0x2f7   :  { %v373_v16 = vmul.f32 %v372_v12, %v353_v3  ;;  %v380_v5 = vrot.slane %v376_v18, %v1441_v19 }
 0x2f9   :  { %v374_v17 = vadd.f32 %v373_v16, %v1438_v15  ;;  %v381_v22 = vmul.f32 %v380_v5, %v280_v61 }
 0x2fb   :  { %1167 = vtanh.f32 %v374_v17 }
 0x305   :  { %v1168_v21 = vpop.eup %1167 }
 0x306   :  { %v386_v23 = vmul.f32 %v1168_v21, %v385_v20 }
 0x308   :  { %v387_v24 = vadd.f32 %v386_v23, %v381_v22 }
 0x30a   :  { %v395_v25 = vsel %vm392_vm15, %v387_v24, 0.0  ;;  %vm690_vm15 = vcmp.ge.s32.totalorder %v1305_v6, 14 }
 0x30b   :  { %396 = vadd.xlane.f32.xlu0 %v395_v25  ;;  %v399_v26 = vmul.f32 %v395_v25, %v395_v25  ;;  %vm1565_vm3 = vmand %vm690_vm15, %vm144_vm2 }
 0x30c   :  { %vm694_vm6 = vmor %vm1565_vm3, %vm1573_vm5 }
 0x30d   :  { %400 = vadd.xlane.f32.xlu1 %v399_v26  ;;  %vm1115_vm2 = vmpackc.low %vm1237_vm9, %vm694_vm6 }
 0x31e   :  { %419 = vperm.xlu1 %1162, %v416_v27  }
 0x398   :  { %v397_v28 = vpop.xlane.xlu0 %396 }
 0x399   :  { %v398_v29 = vmul.f32 0.016129032, %v397_v28 }
 0x39a   :  { %v401_v30 = vpop.xlane.xlu1 %400 }
 0x39b   :  { %v403_v31 = vmul.f32 %v398_v29, %v398_v29  ;;  %v402_v32 = vmul.f32 0.016129032, %v401_v30  ;;  %v409_v38 = vsub.f32 %v395_v25, %v398_v29 }
 0x39d   :  { %v404_v33 = vsub.f32 %v402_v32, %v403_v31 }
 0x39e   :  { %v420_v41 = vpop.permute.xlu1 %419 }
 0x39f   :  { %v405_v34 = vadd.f32 1e-05, %v404_v33 }
 0x3a1   :  { %1169 = vrsqrt.f32 %v405_v34 }
 0x3ab   :  { %v1170_v36 = vpop.eup %1169 }
 0x3ac   :  { %v408_v37 = vmul.f32 %v1170_v36, %v407_v35 }
 0x3ae   :  { %412 = vperm.xlu0 %1161, %v408_v37  }
 0x42d   :  { %v413_v39 = vpop.permute.xlu0 %412 }
 0x42e   :  { %v415_v40 = vmul.f32 %v413_v39, %v409_v38 }
 0x430   :  { %v422_v42 = vadd.f32 %v420_v41, %v415_v40 }
 0x432   :  { %423 = vrot.lane.b32.xlu0 %v422_v42, %s1224_s25 }
 0x4a4   :  { %v424_v45 = vpop.permute.xlu0 %423 }
 0x4a5   :  { %v432_v46 = vsel %vm429_vm7, %v424_v45, 0.0 }
 0x4a6   :  { %435 = vrot.lane.b32.xlu0 %v432_v46, %s1213_s0  ;;  %433 = vrot.lane.b32.xlu1 %v432_v46, %s1214_s1 }
 0x4aa   :  { %439 = vrot.lane.b32.xlu0 %v432_v46, %s1216_s17  ;;  %437 = vrot.lane.b32.xlu1 %v432_v46, %s1215_s4 }
 0x4ae   :  { %443 = vrot.lane.b32.xlu0 %v432_v46, %s1218_s19  ;;  %441 = vrot.lane.b32.xlu1 %v432_v46, %s1217_s18 }
 0x4b2   :  { %447 = vrot.lane.b32.xlu0 %v432_v46, %s1220_s21  ;;  %445 = vrot.lane.b32.xlu1 %v432_v46, %s1219_s20 }
 0x4b6   :  { %451 = vrot.lane.b32.xlu0 %v432_v46, %s1222_s23  ;;  %449 = vrot.lane.b32.xlu1 %v432_v46, %s1221_s22 }
 0x4ba   :  { %455 = vrot.lane.b32.xlu0 %v432_v46, %s1224_s25  ;;  %453 = vrot.lane.b32.xlu1 %v432_v46, %s1223_s24 }
 0x4be   :  { %459 = vrot.lane.b32.xlu0 %v432_v46, %s1226_s27  ;;  %457 = vrot.lane.b32.xlu1 %v432_v46, %s1225_s26 }
 0x4c2   :  { %463 = vrot.lane.b32.xlu0 %v432_v46, %s1228_s29  ;;  %461 = vrot.lane.b32.xlu1 %v432_v46, %s1693_s3 }
 0x4c6   :  { %467 = vrot.lane.b32.xlu0 %v432_v46, %s1694_s5  ;;  %465 = vrot.lane.b32.xlu1 %v432_v46, %s1695_s28 }
 0x4ca   :  { %471 = vrot.lane.b32.xlu0 %v432_v46, %s1696_s10  ;;  %469 = vrot.lane.b32.xlu1 %v432_v46, %s1697_s2 }
 0x4ce   :  { %475 = vrot.lane.b32.xlu0 %v432_v46, %s1234_s16  ;;  %473 = vrot.lane.b32.xlu1 %v432_v46, %s1698_s12 }
 0x4d2   :  { %479 = vrot.lane.b32.xlu0 %v432_v46, %s1236_s11  ;;  %477 = vrot.lane.b32.xlu1 %v432_v46, %s1235_s30 }
 0x518   :  { %v436_v47 = vpop.permute.xlu0 %435  ;;  %v434_v48 = vpop.permute.xlu1 %433 }
 0x519   :  { %v1059_v49 = vpack.c.bf16 %v436_v47, %v434_v48 }
 0x51b   :  { %1060 = vmatpush1.bf16.msra.mxu0 %v1059_v49 }
 0x51c   :  { %v440_v50 = vpop.permute.xlu0 %439  ;;  %v438_v51 = vpop.permute.xlu1 %437  ;;  %1061 = vmatprep.subr.bf16.mxu0 %v1212_v7 }
 0x51d   :  { %v1062_v54 = vpack.c.bf16 %v440_v50, %v438_v51 }
 0x51f   :  { %1063 = vmatpush1.bf16.msra.mxu0 %v1062_v54  ;;  %v981_v54 = vld [vmem:[%s1671_s8 + $0x8] sm:$0xff] }
 0x520   :  { %v444_v55 = vpop.permute.xlu0 %443  ;;  %v442_v58 = vpop.permute.xlu1 %441  ;;  %1064 = vmatprep.subr.bf16.mxu0 %v1212_v7 }
 0x521   :  { %v1065_v59 = vpack.c.bf16 %v444_v55, %v442_v58 }
 0x523   :  { %1066 = vmatpush1.bf16.msra.mxu0 %v1065_v59 }
 0x524   :  { %v448_v60 = vpop.permute.xlu0 %447  ;;  %v446_v61 = vpop.permute.xlu1 %445  ;;  %1067 = vmatprep.subr.bf16.mxu0 %v1212_v7 }
 0x525   :  { %v1068_v63 = vpack.c.bf16 %v448_v60, %v446_v61 }
 0x527   :  { %1069 = vmatpush1.bf16.msra.mxu0 %v1068_v63 }
 0x528   :  { %v452_v1 = vpop.permute.xlu0 %451  ;;  %v450_v2 = vpop.permute.xlu1 %449  ;;  %1070 = vmatprep.subr.bf16.mxu0 %v1212_v7 }
 0x529   :  { %v1071_v3 = vpack.c.bf16 %v452_v1, %v450_v2  ;;  %v980_v2 = vld [vmem:[%s1670_s7 + $0x8] sm:$0xff] }
 0x52b   :  { %1072 = vmatpush1.bf16.msra.mxu0 %v1071_v3 }
 0x52c   :  { %v456_v4 = vpop.permute.xlu0 %455  ;;  %v454_v8 = vpop.permute.xlu1 %453  ;;  %1073 = vmatprep.subr.bf16.mxu0 %v1212_v7 }
 0x52d   :  { %v1074_v9 = vpack.c.bf16 %v456_v4, %v454_v8 }
 0x52f   :  { %1075 = vmatpush1.bf16.msra.mxu0 %v1074_v9 }
 0x530   :  { %v460_v10 = vpop.permute.xlu0 %459  ;;  %v458_v13 = vpop.permute.xlu1 %457  ;;  %1076 = vmatprep.subr.bf16.mxu0 %v1212_v7 }
 0x531   :  { %v1077_v14 = vpack.c.bf16 %v458_v13, %v424_v45 }
 0x533   :  { %1079 = vmatpush1.bf16.msk.msra.mxu0 %vm1078_vm8, %v1077_v14 }
 0x534   :  { %v464_v12 = vpop.permute.xlu0 %463  ;;  %v462_v16 = vpop.permute.xlu1 %461  ;;  %1080 = vmatprep.subr.bf16.mxu0 %v1212_v7 }
 0x535   :  { %v1081_v17 = vpack.c.bf16 %v462_v16, %v460_v10  ;;  %v988_v16 = vld [vmem:[%s1671_s8 + $0x10] sm:$0xff] }
 0x537   :  { %1082 = vmatpush1.bf16.msra.mxu0 %v1081_v17 }
 0x538   :  { %v468_v18 = vpop.permute.xlu0 %467  ;;  %v466_v5 = vpop.permute.xlu1 %465  ;;  %1083 = vmatprep.subr.bf16.mxu0 %v1212_v7 }
 0x539   :  { %v1084_v20 = vpack.c.bf16 %v466_v5, %v464_v12 }
 0x53b   :  { %1085 = vmatpush1.bf16.msra.mxu0 %v1084_v20 }
 0x53c   :  { %v470_v21 = vpop.permute.xlu1 %469  ;;  %1086 = vmatprep.subr.bf16.mxu0 %v1212_v7  ;;  %v472_v23 = vpop.permute.xlu0 %471 }
 0x53d   :  { %v1087_v22 = vpack.c.bf16 %v470_v21, %v468_v18 }
 0x53f   :  { %1088 = vmatpush1.bf16.msra.mxu0 %v1087_v22 }
 0x540   :  { %v474_v24 = vpop.permute.xlu1 %473  ;;  %1089 = vmatprep.subr.bf16.mxu0 %v1212_v7  ;;  %v476_v26 = vpop.permute.xlu0 %475 }
 0x541   :  { %v1090_v25 = vpack.c.bf16 %v474_v24, %v472_v23 }
 0x543   :  { %1091 = vmatpush1.bf16.msra.mxu0 %v1090_v25 }
 0x544   :  { %v478_v27 = vpop.permute.xlu1 %477  ;;  %1092 = vmatprep.subr.bf16.mxu0 %v1212_v7  ;;  %v480_v29 = vpop.permute.xlu0 %479 }
 0x545   :  { %v1093_v28 = vpack.c.bf16 %v478_v27, %v476_v26 }
 0x547   :  { %1094 = vmatpush1.bf16.msra.mxu0 %v1093_v28 }
 0x548   :  { %529 = vmatprep.subr.mxu0 %v1238_v52 }
 0x54b   :  { %530 = vmatpush1.msra.mxu0 %v480_v29 }
 0x54c   :  { %546 = vmatmul.mubr.f32.vlgmr.msra.gmra.mrb[4].mxu0 %v1404_v53 }
 0x54d   :  { %1013 = vmatprep.mubr.msk.f32.mxu0 %vm48_vm0, %v1413_v56 }
 0x61f   :  { %v547_v30 = vpop.f32.mrb[4].mxu0 }
 0x620   :  { %v548_v31 = vadd.f32 %v547_v30, %v1417_v57  ;;  %v549_v32 = vpop.f32.mrb[5].mxu0 }
 0x622   :  { %v551_v33 = vmax.f32 %v548_v31, 0.0 }
 0x624   :  { %1011 = vmatprep.subr.mxu0 %v551_v33 }
 0x625   :  { %1012 = vmatpush3.msra.mxu0 %v551_v33 }
 0x626   :  { %1014 = vmatmul.mubr.msk.f32.vlgmr.msra.gmra.mrb[6].mxu0 %vm48_vm0, %v1423_v62 }
 0x627   :  { %1018 = vmatprep.mubr.msk.f32.mxu0 %vm48_vm0, %v1413_v56 }
 0x6f9   :  { %v1015_v34 = vpop.f32.mrb[6].mxu0 }
 0x6fa   :  { %v627_v35 = vadd.f32 %v1015_v34, %v1431_v0  ;;  %v618_v36 = vpop.f32.mrb[7].mxu0 }
 0x6fc   :  { %v979_v37 = vmul.f32 -1.442695, %v627_v35 }
 0x6fe   :  { %1171 = vpow2.f32 %v979_v37 }
 0x708   :  { %v1172_v38 = vpop.eup %1171 }
 0x709   :  { %v631_v39 = vadd.f32 1.0, %v1172_v38 }
 0x70b   :  { %1173 = vrcp.f32 %v631_v39 }
 0x715   :  { %v1174_v40 = vpop.eup %1173 }
 0x716   :  { %v637_v41 = vrot.slane %v1174_v40, %v1435_v11  ;;  %v641_v44 = vsub.f32 1.0, %v1174_v40  ;;  %v650_v56 = vrot.slane %v1174_v40, %v1441_v19 }
 0x718   :  { %v638_v42 = vmul.f32 %v637_v41, %v618_v36  ;;  %v645_v45 = vrot.slane %v641_v44, %v1441_v19 }
 0x71a   :  { %v639_v43 = vadd.f32 %v638_v42, %v1438_v15  ;;  %v646_v47 = vmul.f32 %v645_v45, %v551_v33 }
 0x71c   :  { %1175 = vtanh.f32 %v639_v43 }
 0x726   :  { %v1176_v46 = vpop.eup %1175 }
 0x727   :  { %v651_v48 = vmul.f32 %v1176_v46, %v650_v56 }
 0x729   :  { %v652_v49 = vadd.f32 %v651_v48, %v646_v47 }
 0x72b   :  { %v658_v50 = vsel %vm655_vm14, %v652_v49, 0.0 }
 0x72c   :  { %659 = vadd.xlane.f32.xlu1 %v658_v50  ;;  %v662_v51 = vmul.f32 %v658_v50, %v658_v50 }
 0x72e   :  { %663 = vadd.xlane.f32.xlu0 %v662_v51 }
 0x73d   :  { %684 = vperm.xlu1 %1162, %v981_v54  }
 0x7b9   :  { %v660_v55 = vpop.xlane.xlu1 %659 }
 0x7ba   :  { %v661_v58 = vmul.f32 0.016666668, %v660_v55 }
 0x7bb   :  { %v664_v59 = vpop.xlane.xlu0 %663 }
 0x7bc   :  { %v666_v60 = vmul.f32 %v661_v58, %v661_v58  ;;  %v665_v61 = vmul.f32 0.016666668, %v664_v59  ;;  %v673_v8 = vsub.f32 %v658_v50, %v661_v58 }
 0x7bd   :  { %v685_v13 = vpop.permute.xlu1 %684 }
 0x7be   :  { %v667_v63 = vsub.f32 %v665_v61, %v666_v60 }
 0x7c0   :  { %v668_v1 = vadd.f32 1e-05, %v667_v63 }
 0x7c2   :  { %1177 = vrsqrt.f32 %v668_v1 }
 0x7cc   :  { %v1178_v3 = vpop.eup %1177 }
 0x7cd   :  { %v672_v4 = vmul.f32 %v1178_v3, %v980_v2 }
 0x7cf   :  { %676 = vperm.xlu0 %1161, %v672_v4  }
 0x84e   :  { %v677_v9 = vpop.permute.xlu0 %676 }
 0x84f   :  { %v679_v10 = vmul.f32 %v677_v9, %v673_v8 }
 0x851   :  { %v687_v14 = vadd.f32 %v685_v13, %v679_v10 }
 0x853   :  { %688 = vrot.lane.b32.xlu1 %v687_v14, %s1224_s25 }
 0x8c5   :  { %v689_v17 = vpop.permute.xlu1 %688 }
 0x8c6   :  { %v697_v18 = vsel %vm694_vm6, %v689_v17, 0.0 }
 0x8c7   :  { %700 = vrot.lane.b32.xlu1 %v697_v18, %s1213_s0  ;;  %698 = vrot.lane.b32.xlu0 %v697_v18, %s1214_s1 }
 0x8cb   :  { %704 = vrot.lane.b32.xlu1 %v697_v18, %s1216_s17  ;;  %702 = vrot.lane.b32.xlu0 %v697_v18, %s1215_s4 }
 0x8cf   :  { %708 = vrot.lane.b32.xlu1 %v697_v18, %s1218_s19  ;;  %706 = vrot.lane.b32.xlu0 %v697_v18, %s1217_s18  ;;  %s1239_s18 = smov [#allocation2]  }
 0x8d0   :  { %s960_s8 = sshll.u32 %s1239_s18, 4  ;;  %s961_s8 = int_to_ptr.vmem [resolvable:$true] %s960_s8 }
 0x8d1   :  { %s1187_s19 = scalar_lea.vmem %s961_s8, 128  ;;  %p1192_p1 = scmp.lt.s32.totalorder %s961_s8, %s961_s8 }
 0x8d2   :  { %p1188_p0 = scmp.ne.s32.totalorder %s961_s8, %s1187_s19  ;;  %p1193_p2 = scmp.lt.s32.totalorder %s1187_s19, %s1187_s19 }
 0x8d3   :  { %712 = vrot.lane.b32.xlu1 %v697_v18, %s1220_s21  ;;  %710 = vrot.lane.b32.xlu0 %v697_v18, %s1219_s20 }
 0x8d4   :  { %p1194_p3 = por %p1193_p2, %p1192_p1 }
 0x8d6   :  { %p1195_p4 = pnand %p1194_p3, %p1188_p0 }
 0x8d7   :  { %716 = vrot.lane.b32.xlu1 %v697_v18, %s1222_s23  ;;  %714 = vrot.lane.b32.xlu0 %v697_v18, %s1221_s22 }
 0x8db   :  { %720 = vrot.lane.b32.xlu1 %v697_v18, %s1224_s25  ;;  %718 = vrot.lane.b32.xlu0 %v697_v18, %s1223_s24 }
 0x8df   :  { %724 = vrot.lane.b32.xlu1 %v697_v18, %s1226_s27  ;;  %722 = vrot.lane.b32.xlu0 %v697_v18, %s1225_s26 }
 0x8e3   :  { %728 = vrot.lane.b32.xlu1 %v697_v18, %s1228_s29  ;;  %726 = vrot.lane.b32.xlu0 %v697_v18, %s1693_s3 }
 0x8e7   :  { %732 = vrot.lane.b32.xlu1 %v697_v18, %s1694_s5  ;;  %730 = vrot.lane.b32.xlu0 %v697_v18, %s1695_s28 }
 0x8eb   :  { %736 = vrot.lane.b32.xlu1 %v697_v18, %s1696_s10  ;;  %734 = vrot.lane.b32.xlu0 %v697_v18, %s1697_s2 }
 0x8ef   :  { %740 = vrot.lane.b32.xlu1 %v697_v18, %s1234_s16  ;;  %738 = vrot.lane.b32.xlu0 %v697_v18, %s1698_s12 }
 0x8f3   :  { %744 = vrot.lane.b32.xlu1 %v697_v18, %s1236_s11  ;;  %742 = vrot.lane.b32.xlu0 %v697_v18, %s1235_s30 }
 0x939   :  { %v701_v5 = vpop.permute.xlu1 %700  ;;  %v699_v20 = vpop.permute.xlu0 %698 }
 0x93a   :  { %v1096_v21 = vpack.c.bf16 %v701_v5, %v699_v20 }
 0x93c   :  { %1097 = vmatpush1.bf16.msra.mxu1 %v1096_v21 }
 0x93d   :  { %v705_v22 = vpop.permute.xlu1 %704  ;;  %v703_v23 = vpop.permute.xlu0 %702  ;;  %1098 = vmatprep.subr.bf16.mxu1 %v1212_v7 }
 0x93e   :  { %v1099_v24 = vpack.c.bf16 %v705_v22, %v703_v23  ;;  %v987_v22 = vld [vmem:[%s1670_s7 + $0x10] sm:$0xff] }
 0x940   :  { %1100 = vmatpush1.bf16.msra.mxu1 %v1099_v24 }
 0x941   :  { %v709_v25 = vpop.permute.xlu1 %708  ;;  %v707_v26 = vpop.permute.xlu0 %706  ;;  %1101 = vmatprep.subr.bf16.mxu1 %v1212_v7 }
 0x942   :  { %v1102_v27 = vpack.c.bf16 %v709_v25, %v707_v26 }
 0x944   :  { %1103 = vmatpush1.bf16.msra.mxu1 %v1102_v27 }
 0x945   :  { %v713_v28 = vpop.permute.xlu1 %712  ;;  %v711_v29 = vpop.permute.xlu0 %710  ;;  %1104 = vmatprep.subr.bf16.mxu1 %v1212_v7 }
 0x946   :  { %v1105_v30 = vpack.c.bf16 %v713_v28, %v711_v29 }
 0x948   :  { %1106 = vmatpush1.bf16.msra.mxu1 %v1105_v30 }
 0x949   :  { %v717_v31 = vpop.permute.xlu1 %716  ;;  %v715_v32 = vpop.permute.xlu0 %714  ;;  %1107 = vmatprep.subr.bf16.mxu1 %v1212_v7 }
 0x94a   :  { %v1108_v33 = vpack.c.bf16 %v717_v31, %v715_v32 }
 0x94c   :  { %1109 = vmatpush1.bf16.msra.mxu1 %v1108_v33 }
 0x94d   :  { %v721_v34 = vpop.permute.xlu1 %720  ;;  %v719_v35 = vpop.permute.xlu0 %718  ;;  %1110 = vmatprep.subr.bf16.mxu1 %v1212_v7 }
 0x94e   :  { %v1111_v36 = vpack.c.bf16 %v721_v34, %v719_v35 }
 0x950   :  { %1112 = vmatpush1.bf16.msra.mxu1 %v1111_v36 }
 0x951   :  { %v725_v37 = vpop.permute.xlu1 %724  ;;  %v723_v38 = vpop.permute.xlu0 %722  ;;  %1113 = vmatprep.subr.bf16.mxu1 %v1212_v7 }
 0x952   :  { %v1114_v39 = vpack.c.bf16 %v723_v38, %v689_v17 }
 0x954   :  { %1116 = vmatpush1.bf16.msk.msra.mxu1 %vm1115_vm2, %v1114_v39 }
 0x955   :  { %v729_v40 = vpop.permute.xlu1 %728  ;;  %v727_v41 = vpop.permute.xlu0 %726  ;;  %1117 = vmatprep.subr.bf16.mxu1 %v1212_v7 }
 0x956   :  { %v1118_v42 = vpack.c.bf16 %v727_v41, %v725_v37 }
 0x958   :  { %1119 = vmatpush1.bf16.msra.mxu1 %v1118_v42 }
 0x959   :  { %v733_v43 = vpop.permute.xlu1 %732  ;;  %v731_v44 = vpop.permute.xlu0 %730  ;;  %1120 = vmatprep.subr.bf16.mxu1 %v1212_v7 }
 0x95a   :  { %v1121_v45 = vpack.c.bf16 %v731_v44, %v729_v40 }
 0x95c   :  { %1122 = vmatpush1.bf16.msra.mxu1 %v1121_v45 }
 0x95d   :  { %v735_v56 = vpop.permute.xlu0 %734  ;;  %1123 = vmatprep.subr.bf16.mxu1 %v1212_v7  ;;  %v737_v47 = vpop.permute.xlu1 %736 }
 0x95e   :  { %v1124_v46 = vpack.c.bf16 %v735_v56, %v733_v43 }
 0x960   :  { %1125 = vmatpush1.bf16.msra.mxu1 %v1124_v46 }
 0x961   :  { %v739_v48 = vpop.permute.xlu0 %738  ;;  %1126 = vmatprep.subr.bf16.mxu1 %v1212_v7  ;;  %v741_v50 = vpop.permute.xlu1 %740 }
 0x962   :  { %v1127_v49 = vpack.c.bf16 %v739_v48, %v737_v47 }
 0x964   :  { %1128 = vmatpush1.bf16.msra.mxu1 %v1127_v49 }
 0x965   :  { %v743_v51 = vpop.permute.xlu0 %742  ;;  %1129 = vmatprep.subr.bf16.mxu1 %v1212_v7  ;;  %v745_v55 = vpop.permute.xlu1 %744 }
 0x966   :  { %v1130_v54 = vpack.c.bf16 %v743_v51, %v741_v50 }
 0x968   :  { %1131 = vmatpush1.bf16.msra.mxu1 %v1130_v54 }
 0x969   :  { %794 = vmatprep.subr.mxu1 %v1238_v52 }
 0x96c   :  { %795 = vmatpush1.msra.mxu1 %v745_v55 }
 0x96d   :  { %811 = vmatmul.mubr.f32.vlgmr.msra.gmra.mrb[2].mxu1 %v1404_v53 }
 0xa40   :  { %v812_v58 = vpop.f32.mrb[2].mxu1 }
 0xa41   :  { %v813_v59 = vadd.f32 %v812_v58, %v1417_v57  ;;  %v814_v60 = vpop.f32.mrb[3].mxu1 }
 0xa43   :  { %v816_v61 = vmax.f32 %v813_v59, 0.0 }
 0xa45   :  { %1016 = vmatprep.subr.mxu0 %v816_v61 }
 0xa46   :  { %1017 = vmatpush3.msra.mxu0 %v816_v61 }
 0xa47   :  { %1019 = vmatmul.mubr.msk.f32.vlgmr.msra.gmra.mrb[8].mxu0 %vm48_vm0, %v1423_v62  ;;  %vm918_vm0 = vmand %vm690_vm15, %vm388_vm11 }
 0xa48   :  { %vm920_vm9 = vmor %vm918_vm0, %vm919_vm4 }
 0xb1a   :  { %v1020_v63 = vpop.f32.mrb[8].mxu0 }
 0xb1b   :  { %v892_v7 = vadd.f32 %v1020_v63, %v1431_v0  ;;  %v883_v1 = vpop.f32.mrb[9].mxu0 }
 0xb1d   :  { %v986_v2 = vmul.f32 -1.442695, %v892_v7 }
 0xb1f   :  { %1179 = vpow2.f32 %v986_v2 }
 0xb29   :  { %v1180_v52 = vpop.eup %1179 }
 0xb2a   :  { %v896_v3 = vadd.f32 1.0, %v1180_v52 }
 0xb2c   :  { %1181 = vrcp.f32 %v896_v3 }
 0xb36   :  { %v1182_v53 = vpop.eup %1181 }
 0xb37   :  { %v902_v4 = vrot.slane %v1182_v53, %v1435_v11  ;;  %v906_v9 = vsub.f32 1.0, %v1182_v53  ;;  %v915_v62 = vrot.slane %v1182_v53, %v1441_v19 }
 0xb39   :  { %v903_v57 = vmul.f32 %v902_v4, %v883_v1  ;;  %v910_v10 = vrot.slane %v906_v9, %v1441_v19 }
 0xb3b   :  { %v904_v8 = vadd.f32 %v903_v57, %v1438_v15  ;;  %v911_v11 = vmul.f32 %v910_v10, %v816_v61 }
 0xb3d   :  { %1183 = vtanh.f32 %v904_v8 }
 0xb47   :  { %v1184_v0 = vpop.eup %1183 }
 0xb48   :  { %v916_v13 = vmul.f32 %v1184_v0, %v915_v62 }
 0xb4a   :  { %v917_v15 = vadd.f32 %v916_v13, %v911_v11 }
 0xb4c   :  { %v923_v14 = vsel %vm920_vm9, %v917_v15, 0.0 }
 0xb4d   :  { %924 = vadd.xlane.f32.xlu0 %v923_v14  ;;  %v927_v12 = vmul.f32 %v923_v14, %v923_v14 }
 0xb4f   :  { %928 = vadd.xlane.f32.xlu1 %v927_v12 }
 0xb60   :  { %949 = vperm.xlu1 %1162, %v988_v16  }
 0xbda   :  { %v925_v19 = vpop.xlane.xlu0 %924 }
 0xbdb   :  { %v926_v17 = vmul.f32 0.01724138, %v925_v19 }
 0xbdc   :  { %v929_v18 = vpop.xlane.xlu1 %928 }
 0xbdd   :  { %v931_v5 = vmul.f32 %v926_v17, %v926_v17  ;;  %v930_v6 = vmul.f32 0.01724138, %v929_v18  ;;  %v938_v25 = vsub.f32 %v923_v14, %v926_v17 }
 0xbdf   :  { %v932_v20 = vsub.f32 %v930_v6, %v931_v5 }
 0xbe0   :  { %v950_v28 = vpop.permute.xlu1 %949 }
 0xbe1   :  { %v933_v21 = vadd.f32 1e-05, %v932_v20 }
 0xbe3   :  { %1185 = vrsqrt.f32 %v933_v21 }
 0xbed   :  { %v1186_v23 = vpop.eup %1185 }
 0xbee   :  { %v937_v24 = vmul.f32 %v1186_v23, %v987_v22 }
 0xbf0   :  { %941 = vperm.xlu0 %1161, %v937_v24  }
 0xc6f   :  { %v942_v26 = vpop.permute.xlu0 %941 }
 0xc70   :  { %v944_v27 = vmul.f32 %v942_v26, %v938_v25 }
 0xc72   :  { %v952_v29 = vadd.f32 %v950_v28, %v944_v27 }
 0xc74   :  { %953 = vst [vmem:[#allocation2] sm:$0xff] %v952_v29 }
 0xc75   :  { %1198 = shalt.err (!%p1195_p4)
}
 0xc76   :  { %s1199_s21 = scalar_lea.hbm %s1672_s9, 128 }
 0xc77   :  { %p1200_p5 = scmp.ne.s32.totalorder %s1672_s9, %s1199_s21  ;;  %p1203_p6 = scmp.lt.u32.totalorder %s1199_s21, %s1672_s9 }
 0xc79   :  { %p1205_p7 = pnand %p1203_p6, %p1200_p5 }
 0xc7b   :  { %1208 = shalt.err (!%p1205_p7)
}
 0xc7c   :  { %963 = dma.vmem_to_hbm [thread:$0]  %s961_s8, 128, %s1672_s9, [#allocation3]  }
 0xc7d   :  { %1209 = dma.done.wait [#allocation3], 128  }
 0xc7e   :  { %1210 = vsyncadd [#allocation3], 4294967168 }
 0xc7f   :  { %967 = vsyncpa [#allocation3], 1 }

</bundles_post_ra>
